<compile_context>
chip_gen: v7x
topology: tpu7x:2x2x1
jax: 0.10.0
libtpu: 0.0.40
codegen_flags: <defaults>
</compile_context>

<pallas_src>
import functools

import jax
import jax.numpy as jnp
from jax import lax
from jax.experimental import pallas as pl
from jax.experimental.pallas import tpu as pltpu

LANE = 128


def _round_up(v, m):
    return (v + m - 1) // m * m


def _pick_divisor_tile(n_pad, want):
    """Largest multiple of LANE that divides n_pad and is <= want."""
    want = max(LANE, want)
    best = LANE
    t = LANE
    while t <= min(want, n_pad):
        if n_pad % t == 0:
            best = t
        t += LANE
    return best


def _leaky_relu(v, slope=0.2):
    # slope < 1  =>  leaky_relu(v) == max(v, slope*v): no compare+select pair.
    return jnp.maximum(v, slope * v)


def _elu(v):
    # masked form: never feeds large positives into exp
    return jnp.where(v > 0, v, jnp.exp(jnp.minimum(v, 0.0)) - 1.0)


# ---------------------------------------------------------------------------
# Kernel 1: lane-dense linear (+ optional ReLU, optional ones-column injection)
# ---------------------------------------------------------------------------
def _linear_kernel(x_ref, w_ref, b_ref, o_ref, *, relu, ones_col):
    y = jnp.dot(x_ref[...], w_ref[...], preferred_element_type=jnp.float32)
    y = y + b_ref[...]
    if relu:
        y = jnp.maximum(y, 0.0)
    if ones_col is not None:
        col = lax.broadcasted_iota(jnp.int32, y.shape, 1)
        y = jnp.where(col == ones_col, 1.0, y)
    o_ref[...] = y.astype(o_ref.dtype)


def _linear(x_p, w_p, b_p, *, tile, relu=False, ones_col=None):
    n_pad, in_pad = x_p.shape
    out_pad = w_p.shape[1]
    kernel = functools.partial(_linear_kernel, relu=relu, ones_col=ones_col)
    return pl.pallas_call(
        kernel,
        out_shape=jax.ShapeDtypeStruct((n_pad, out_pad), jnp.float32),
        grid_spec=pltpu.PrefetchScalarGridSpec(
            num_scalar_prefetch=0,
            grid=(n_pad // tile,),
            in_specs=[pl.BlockSpec((tile, in_pad), lambda q: (q, 0)),
                      pl.BlockSpec((in_pad, out_pad), lambda q: (0, 0)),
                      pl.BlockSpec((1, out_pad), lambda q: (0, 0))],
            out_specs=pl.BlockSpec((tile, out_pad), lambda q: (q, 0))),
        compiler_params=pltpu.CompilerParams(
            dimension_semantics=("parallel",)),
    )(x_p, w_p, b_p)


# ---------------------------------------------------------------------------
# Kernel 2: one GTAN hop, tiled over the dense adjacency.
#   x, h carry an extra "ones" column at index n_hid (zero padding above it),
#   so  acc = sum_k w_tile @ h_tile  holds the numerator in cols < n_hid and
#   the row-sum normalizer in col n_hid; adding w2 * x completes num and div.
#   x1 (= x·a1), h1 (= h·a2) and w2 (= exp(leaky(x·a1 + x·a2))) are
#   precomputed per hop in the wrapper and streamed — nothing but the
#   aggregation matmul and the per-edge weight math runs on the N^2 path.
# ---------------------------------------------------------------------------
def _gtan_hop_kernel(adj_ref, x_ref, h_ref, x1_ref, h1_ref, w2_ref,
                     out_ref, acc_ref, *, n_hid):
    k = pl.program_id(1)

    @pl.when(k == 0)
    def _():
        acc_ref[...] = jnp.zeros_like(acc_ref)

    # fused per-tile edge weights (never materialize a full (N, N) temp)
    v = x1_ref[...] + h1_ref[...]                       # (TQ,1)+(1,TK) -> (TQ,TK)
    e = jnp.exp(_leaky_relu(v))                         # f32, EUP
    w = (adj_ref[...].astype(jnp.float32) * e).astype(jnp.bfloat16)

    # single bf16 MXU matmul -> numerator (cols < n_hid) + row-sum (col n_hid)
    acc_ref[...] += jnp.dot(w, h_ref[...],
                            preferred_element_type=jnp.float32)

    @pl.when(k == pl.num_programs(1) - 1)
    def _():
        x = x_ref[...]                                  # (TQ, HPAD) f32, ones col
        # x carries the ones column, so w2 * x adds w2 into the div column too.
        total = acc_ref[...] + w2_ref[...] * x          # (TQ, HPAD)
        div = total[:, n_hid:n_hid + 1]                 # (TQ, 1) > 0
        h_new = _elu(total * pl.reciprocal(div, approx=True))
        col = lax.broadcasted_iota(jnp.int32, h_new.shape, 1)
        out_ref[...] = jnp.where(col == n_hid, 1.0, h_new).astype(out_ref.dtype)


def _hop_vmem_bytes(tq, tk, hpad):
    adj_b = 2 * tq * tk * 1            # int8, double-buffered
    x_b = 2 * tq * hpad * 4            # f32 rows
    h_b = 2 * tk * hpad * 2            # bf16 cols
    x1_b = 2 * tq * 4
    h1_b = 2 * tk * 4
    w2_b = 2 * tq * 4
    out_b = 2 * tq * hpad * 2          # bf16 out
    acc_b = tq * hpad * 4              # f32 accumulator scratch
    return adj_b + x_b + h_b + x1_b + h1_b + w2_b + out_b + acc_b


def _gtan_hop(adj_i8, x_aug, h_bf16, x1_col, h1_row, w2_col, *, tq, tk, n_hid):
    n_pad, hpad = x_aug.shape
    kernel = functools.partial(_gtan_hop_kernel, n_hid=n_hid)
    # keep headroom inside v7x's 64 MiB physical VMEM
    vmem_limit = min(48 * 1024 * 1024,
                     max(16 * 1024 * 1024, 2 * _hop_vmem_bytes(tq, tk, hpad)))
    return pl.pallas_call(
        kernel,
        out_shape=jax.ShapeDtypeStruct((n_pad, hpad), jnp.bfloat16),
        grid_spec=pltpu.PrefetchScalarGridSpec(
            num_scalar_prefetch=0,
            grid=(n_pad // tq, n_pad // tk),        # reduction (col) axis last
            in_specs=[pl.BlockSpec((tq, tk), lambda q, k: (q, k)),     # adj int8
                      pl.BlockSpec((tq, hpad), lambda q, k: (q, 0)),   # x rows f32
                      pl.BlockSpec((tk, hpad), lambda q, k: (k, 0)),   # h cols bf16
                      pl.BlockSpec((tq, 1), lambda q, k: (q, 0)),      # x·a1 rows
                      pl.BlockSpec((1, tk), lambda q, k: (0, k)),      # h·a2 cols
                      pl.BlockSpec((tq, 1), lambda q, k: (q, 0))],     # w2 rows
            out_specs=pl.BlockSpec((tq, hpad), lambda q, k: (q, 0)),
            scratch_shapes=[pltpu.VMEM((tq, hpad), jnp.float32)]),
        compiler_params=pltpu.CompilerParams(
            dimension_semantics=("parallel", "arbitrary"),
            vmem_limit_bytes=vmem_limit),
    )(adj_i8, x_aug, h_bf16, x1_col, h1_row, w2_col)


# ---------------------------------------------------------------------------
# Forward wrapper: pad to lane-dense shapes, fc1 -> hop loop -> fc2, slice back.
# ---------------------------------------------------------------------------
def gtan_forward(x, adj, params, *, hop, tq=1024, tk=512, lin_tile=512):
    N, n_in = x.shape
    n_hid = params["fc1_w"].shape[1]
    n_out = params["fc2_w"].shape[1]

    hpad = _round_up(n_hid + 1, LANE)      # +1 for the "ones" column
    in_pad = _round_up(n_in, LANE)
    out_pad = _round_up(n_out, LANE)

    n_pad = _round_up(N, LANE)
    # keep >= 2 row blocks when the graph allows it (megacore on v7x)
    want_q = min(tq, n_pad if n_pad < 2 * LANE else n_pad // 2)
    tq_eff = _pick_divisor_tile(n_pad, want_q)
    tk_eff = _pick_divisor_tile(n_pad, tk)
    t_lin = _pick_divisor_tile(n_pad, lin_tile)

    f32 = jnp.float32
    x_p = jnp.zeros((n_pad, in_pad), f32).at[:N, :n_in].set(x.astype(f32))
    # int8 adjacency: exact for edge multiplicities <= 127.
    # TODO(synk): fall back to int16/bf16 storage for heavier multigraph edges.
    adj_i8 = jnp.zeros((n_pad, n_pad), jnp.int8).at[:N, :N].set(
        jnp.clip(adj, 0.0, 127.0).astype(jnp.int8))
    w1_p = jnp.zeros((in_pad, hpad), f32).at[:n_in, :n_hid].set(params["fc1_w"])
    b1_p = jnp.zeros((1, hpad), f32).at[0, :n_hid].set(params["fc1_b"].reshape(-1))
    w2_p = jnp.zeros((hpad, out_pad), f32).at[:n_hid, :n_out].set(params["fc2_w"])
    b2_p = jnp.zeros((1, out_pad), f32).at[0, :n_out].set(params["fc2_b"].reshape(-1))
    a1_p = jnp.zeros((hop, hpad), f32).at[:, :n_hid].set(params["attn1"])
    a2_p = jnp.zeros((hop, hpad), f32).at[:, :n_hid].set(params["attn2"])

    # fc1 + ReLU (+ ones column). dropout is identity in eval mode.
    x_aug = _linear(x_p, w1_p, b1_p, tile=t_lin, relu=True, ones_col=n_hid)
    h = x_aug.astype(jnp.bfloat16)

    # x-side attention projections are hop-only-dependent on the per-hop attn
    # vectors, not on h -> compute them all at once (tiny (N, hop) matmuls).
    x1_all = x_aug @ a1_p.T                               # (n_pad, hop)
    xa2_all = x_aug @ a2_p.T                              # (n_pad, hop)
    w2_all = jnp.exp(_leaky_relu(x1_all + xa2_all))       # (n_pad, hop)

    for i in range(hop):                   # layerwise=True: per-hop attn weights
        # h-side projection depends on the previous hop's h: one tiny pass/hop.
        h1_row = (h.astype(f32) @ a2_p[i]).reshape(1, n_pad)
        h = _gtan_hop(adj_i8, x_aug, h,
                      x1_all[:, i:i + 1], h1_row, w2_all[:, i:i + 1],
                      tq=tq_eff, tk=tk_eff, n_hid=n_hid)

    out_p = _linear(h.astype(f32), w2_p, b2_p, tile=t_lin,
                    relu=False, ones_col=None)
    return out_p[:N, :n_out]


# ---------------------------------------------------------------------------
# Pure-JAX reference following the original edge-list (scatter) formulation.
# ---------------------------------------------------------------------------
def gtan_ref(x, s, t, params, *, hop, N):
    x = jnp.maximum(x @ params["fc1_w"] + params["fc1_b"], 0.0)
    h = x
    for i in range(hop):
        a1 = params["attn1"][i]
        a2 = params["attn2"][i]
        x1 = jnp.sum(x * a1, axis=-1, keepdims=True)
        h1 = jnp.sum(h * a2, axis=-1, keepdims=True)
        w2 = jnp.exp(_leaky_relu(x1 + jnp.sum(x * a2, axis=-1, keepdims=True)))
        w1 = jnp.exp(_leaky_relu(x1[s] + h1[t]))
        div = jax.ops.segment_sum(w1, s, num_segments=N) + w2
        hh = jax.ops.segment_sum(w1 * h[t], s, num_segments=N) + w2 * x
        r = hh / div
        h = jnp.where(r > 0, r, jnp.exp(jnp.minimum(r, 0.0)) - 1.0)
    return h @ params["fc2_w"] + params["fc2_b"]


# ---------------------------------------------------------------------------
# Deterministic parameter construction (mirrors reset_parameters with xavier).
# ---------------------------------------------------------------------------
def _xavier_uniform(key, shape, gain):
    fan_in, fan_out = shape  # stored as (in_features, out_features)
    a = gain * (6.0 / (fan_in + fan_out)) ** 0.5
    return jax.random.uniform(key, shape, jnp.float32, -a, a)


def make_params(key, n_in, n_hid, n_out, hop):
    ks = jax.random.split(key, 4 + 2 * hop)
    relu_gain = 2.0 ** 0.5
    fc1_w = _xavier_uniform(ks[0], (n_in, n_hid), relu_gain)
    fc1_b = jax.random.uniform(ks[1], (1, n_hid), jnp.float32,
                               -1.0 / n_in ** 0.5, 1.0 / n_in ** 0.5)
    fc2_w = _xavier_uniform(ks[2], (n_hid, n_out), 1.414)
    fc2_b = jax.random.uniform(ks[3], (1, n_out), jnp.float32,
                               -1.0 / n_hid ** 0.5, 1.0 / n_hid ** 0.5)
    attn1 = jnp.stack([_xavier_uniform(ks[4 + i], (n_hid, 1), relu_gain)[:, 0]
                       for i in range(hop)])              # (hop, n_hid)
    attn2 = jnp.stack([_xavier_uniform(ks[4 + hop + i], (n_hid, 1), relu_gain)[:, 0]
                       for i in range(hop)])              # (hop, n_hid)
    return dict(fc1_w=fc1_w, fc1_b=fc1_b, fc2_w=fc2_w, fc2_b=fc2_b,
                attn1=attn1, attn2=attn2)


if __name__ == "__main__":
    N, n_in, n_hid, n_out, hop, E = 64, 16, 32, 8, 4, 256

    key = jax.random.PRNGKey(0)
    k_x, k_s, k_t, k_p = jax.random.split(key, 4)

    x = jax.random.normal(k_x, (N, n_in), jnp.float32)
    src = jax.random.randint(k_s, (E,), 0, N)
    tgt = jax.random.randint(k_t, (E,), 0, N)
    # dense adjacency with edge multiplicities; adj[s, t] += 1
    adj = jnp.zeros((N, N), jnp.float32).at[src, tgt].add(1.0)

    params = make_params(k_p, n_in, n_hid, n_out, hop)

    fwd = jax.jit(functools.partial(gtan_forward, hop=hop))
    out = jax.block_until_ready(fwd(x, adj, params))

    ref = gtan_ref(x, src, tgt, params, hop=hop, N=N)

    assert out.shape == (N, n_out)
    assert bool(jnp.all(jnp.isfinite(out)))
    max_err = float(jnp.max(jnp.abs(out - ref)))
    # bf16 aggregation matmul + bf16 h carry + approx reciprocal over 4 hops
    # -> loose tolerance
    assert jnp.allclose(out, ref, rtol=2e-1, atol=2e-1), max_err

    print("KERNEL_OK")
</pallas_src>

<mosaic_0001>
module attributes {stable_mosaic.version = 11 : i64} {
  func.func @_linear_kernel(%arg0: i32, %arg1: memref<128x128xf32, #tpu.memory_space<vmem>>, %arg2: memref<128x128xf32, #tpu.memory_space<vmem>>, %arg3: memref<1x128xf32, #tpu.memory_space<vmem>>, %arg4: memref<128x128xf32, #tpu.memory_space<vmem>>) attributes {dimension_semantics = [#tpu.dimension_semantics<parallel>], iteration_bounds = array<i64: 1>, scalar_prefetch = 0 : i64, scratch_operands = 0 : i64, tpu.core_type = #tpu.core_type<tc>, window_params = [{transform_indices = @transform_0, window_bounds = array<i64: 128, 128>}, {pipeline_mode = #tpu.pipeline_mode<synchronous>, transform_indices = @transform_1, window_bounds = array<i64: 128, 128>}, {pipeline_mode = #tpu.pipeline_mode<synchronous>, transform_indices = @transform_2, window_bounds = array<i64: 1, 128>}, {transform_indices = @transform_3, window_bounds = array<i64: 128, 128>}]} {
    %c0 = arith.constant 0 : index
    %c0_0 = arith.constant 0 : index
    %0 = vector.load %arg1[%c0, %c0_0] : memref<128x128xf32, #tpu.memory_space<vmem>>, vector<128x128xf32>
    %c0_1 = arith.constant 0 : index
    %c0_2 = arith.constant 0 : index
    %1 = vector.load %arg2[%c0_1, %c0_2] : memref<128x128xf32, #tpu.memory_space<vmem>>, vector<128x128xf32>
    %cst = arith.constant dense<0.000000e+00> : vector<128x128xf32>
    %2 = tpu.matmul %0, %1, %cst {dimension_numbers = #tpu.dot_dimension_numbers<[1], [0], [0], [1], [0, 0, 1, 1], [], []>} : vector<128x128xf32>, vector<128x128xf32>, vector<128x128xf32> -> vector<128x128xf32>
    %c0_3 = arith.constant 0 : index
    %c0_4 = arith.constant 0 : index
    %3 = vector.load %arg3[%c0_3, %c0_4] : memref<1x128xf32, #tpu.memory_space<vmem>>, vector<1x128xf32>
    %4 = vector.broadcast %3 : vector<1x128xf32> to vector<128x128xf32>
    %5 = arith.addf %2, %4 : vector<128x128xf32>
    %cst_5 = arith.constant 0.000000e+00 : f32
    %6 = vector.broadcast %cst_5 : f32 to vector<128x128xf32>
    %7 = arith.maximumf %5, %6 : vector<128x128xf32>
    %8 = tpu.iota {dimensions = array<i32: 1>} : vector<128x128xi32>
    %c32_i32 = arith.constant 32 : i32
    %9 = vector.broadcast %c32_i32 : i32 to vector<128x128xi32>
    %10 = arith.cmpi eq, %8, %9 : vector<128x128xi32>
    %cst_6 = arith.constant 1.000000e+00 : f32
    %11 = vector.broadcast %cst_6 : f32 to vector<128x128xf32>
    %12 = arith.select %10, %11, %7 : vector<128x128xi1>, vector<128x128xf32>
    %c0_7 = arith.constant 0 : index
    %c0_8 = arith.constant 0 : index
    %13 = vector.load %arg4[%c0_7, %c0_8] : memref<128x128xf32, #tpu.memory_space<vmem>>, vector<128x128xf32>
    tpu.vector_store %arg4[%c0_7, %c0_8], %12 {strides = array<i32>} : memref<128x128xf32, #tpu.memory_space<vmem>>, vector<128x128xf32>,
    return
  }
  func.func @transform_0(%arg0: i32) -> (i32, i32) {
    %c0_i32 = arith.constant 0 : i32
    %c0_i32_0 = arith.constant 0 : i32
    return %arg0, %c0_i32 : i32, i32
  }
  func.func @transform_1(%arg0: i32) -> (i32, i32) {
    %c0_i32 = arith.constant 0 : i32
    %c0_i32_0 = arith.constant 0 : i32
    %c0_i32_1 = arith.constant 0 : i32
    return %c0_i32, %c0_i32_0 : i32, i32
  }
  func.func @transform_2(%arg0: i32) -> (i32, i32) {
    %c0_i32 = arith.constant 0 : i32
    %c0_i32_0 = arith.constant 0 : i32
    %c0_i32_1 = arith.constant 0 : i32
    return %c0_i32, %c0_i32_0 : i32, i32
  }
  func.func @transform_3(%arg0: i32) -> (i32, i32) {
    %c0_i32 = arith.constant 0 : i32
    %c0_i32_0 = arith.constant 0 : i32
    return %arg0, %c0_i32 : i32, i32
  }
}

module attributes {stable_mosaic.version = 11 : i64} {
  func.func @_gtan_hop_kernel(%arg0: i32, %arg1: i32, %arg2: memref<128x128xi8, #tpu.memory_space<vmem>>, %arg3: memref<128x128xf32, #tpu.memory_space<vmem>>, %arg4: memref<128x128xbf16, #tpu.memory_space<vmem>>, %arg5: memref<128x1xf32, #tpu.memory_space<vmem>>, %arg6: memref<1x128xf32, #tpu.memory_space<vmem>>, %arg7: memref<128x1xf32, #tpu.memory_space<vmem>>, %arg8: memref<128x128xbf16, #tpu.memory_space<vmem>>, %arg9: memref<128x128xf32, #tpu.memory_space<vmem>>) attributes {dimension_semantics = [#tpu.dimension_semantics<parallel>, #tpu.dimension_semantics<arbitrary>], iteration_bounds = array<i64: 1, 1>, scalar_prefetch = 0 : i64, scratch_operands = 1 : i64, tpu.core_type = #tpu.core_type<tc>, window_params = [{transform_indices = @transform_0, window_bounds = array<i64: 128, 128>}, {transform_indices = @transform_1, window_bounds = array<i64: 128, 128>}, {transform_indices = @transform_2, window_bounds = array<i64: 128, 128>}, {transform_indices = @transform_3, window_bounds = array<i64: 128, 1>}, {transform_indices = @transform_4, window_bounds = array<i64: 1, 128>}, {transform_indices = @transform_5, window_bounds = array<i64: 128, 1>}, {transform_indices = @transform_6, window_bounds = array<i64: 128, 128>}]} {
    %c0_i32 = arith.constant 0 : i32
    %0 = arith.cmpi eq, %arg1, %c0_i32 : i32
    %1 = arith.extui %0 : i1 to i32
    %c0_i32_0 = arith.constant 0 : i32
    %2 = arith.cmpi ne, %1, %c0_i32_0 : i32
    scf.if %2 {
      %cst_15 = arith.constant 0.000000e+00 : f32
      %24 = vector.broadcast %cst_15 : f32 to vector<128x128xf32>
      %c0_16 = arith.constant 0 : index
      %c0_17 = arith.constant 0 : index
      %25 = vector.load %arg9[%c0_16, %c0_17] : memref<128x128xf32, #tpu.memory_space<vmem>>, vector<128x128xf32>
      tpu.vector_store %arg9[%c0_16, %c0_17], %24 {strides = array<i32>} : memref<128x128xf32, #tpu.memory_space<vmem>>, vector<128x128xf32>,
    } else {
    }
    %c0 = arith.constant 0 : index
    %c0_1 = arith.constant 0 : index
    %3 = vector.load %arg5[%c0, %c0_1] : memref<128x1xf32, #tpu.memory_space<vmem>>, vector<128x1xf32>
    %c0_2 = arith.constant 0 : index
    %c0_3 = arith.constant 0 : index
    %4 = vector.load %arg6[%c0_2, %c0_3] : memref<1x128xf32, #tpu.memory_space<vmem>>, vector<1x128xf32>
    %5 = vector.broadcast %3 : vector<128x1xf32> to vector<128x128xf32>
    %6 = vector.broadcast %4 : vector<1x128xf32> to vector<128x128xf32>
    %7 = arith.addf %5, %6 : vector<128x128xf32>
    %cst = arith.constant 2.000000e-01 : f32
    %8 = vector.broadcast %cst : f32 to vector<128x128xf32>
    %9 = arith.mulf %8, %7 : vector<128x128xf32>
    %10 = arith.maximumf %7, %9 : vector<128x128xf32>
    %11 = math.exp %10 : vector<128x128xf32>
    %c0_4 = arith.constant 0 : index
    %c0_5 = arith.constant 0 : index
    %12 = vector.load %arg2[%c0_4, %c0_5] : memref<128x128xi8, #tpu.memory_space<vmem>>, vector<128x128xi8>
    %13 = arith.sitofp %12 : vector<128x128xi8> to vector<128x128xf32>
    %14 = arith.mulf %13, %11 : vector<128x128xf32>
    %15 = arith.truncf %14 : vector<128x128xf32> to vector<128x128xbf16>
    %c0_6 = arith.constant 0 : index
    %c0_7 = arith.constant 0 : index
    %16 = vector.load %arg9[%c0_6, %c0_7] : memref<128x128xf32, #tpu.memory_space<vmem>>, vector<128x128xf32>
    %c0_8 = arith.constant 0 : index
    %c0_9 = arith.constant 0 : index
    %17 = vector.load %arg4[%c0_8, %c0_9] : memref<128x128xbf16, #tpu.memory_space<vmem>>, vector<128x128xbf16>
    %cst_10 = arith.constant dense<0.000000e+00> : vector<128x128xf32>
    %18 = tpu.matmul %15, %17, %cst_10 {dimension_numbers = #tpu.dot_dimension_numbers<[1], [0], [0], [1], [0, 0, 1, 1], [], []>} : vector<128x128xbf16>, vector<128x128xbf16>, vector<128x128xf32> -> vector<128x128xf32>
    %19 = arith.addf %16, %18 : vector<128x128xf32>
    %c0_11 = arith.constant 0 : index
    %c0_12 = arith.constant 0 : index
    %20 = vector.load %arg9[%c0_11, %c0_12] : memref<128x128xf32, #tpu.memory_space<vmem>>, vector<128x128xf32>
    tpu.vector_store %arg9[%c0_11, %c0_12], %19 {strides = array<i32>} : memref<128x128xf32, #tpu.memory_space<vmem>>, vector<128x128xf32>,
    %c0_i32_13 = arith.constant 0 : i32
    %21 = arith.cmpi eq, %arg1, %c0_i32_13 : i32
    %22 = arith.extui %21 : i1 to i32
    %c0_i32_14 = arith.constant 0 : i32
    %23 = arith.cmpi ne, %22, %c0_i32_14 : i32
    scf.if %23 {
      %c0_15 = arith.constant 0 : index
      %c0_16 = arith.constant 0 : index
      %24 = vector.load %arg3[%c0_15, %c0_16] : memref<128x128xf32, #tpu.memory_space<vmem>>, vector<128x128xf32>
      %c0_17 = arith.constant 0 : index
      %c0_18 = arith.constant 0 : index
      %25 = vector.load %arg9[%c0_17, %c0_18] : memref<128x128xf32, #tpu.memory_space<vmem>>, vector<128x128xf32>
      %c0_19 = arith.constant 0 : index
      %c0_20 = arith.constant 0 : index
      %26 = vector.load %arg7[%c0_19, %c0_20] : memref<128x1xf32, #tpu.memory_space<vmem>>, vector<128x1xf32>
      %27 = vector.broadcast %26 : vector<128x1xf32> to vector<128x128xf32>
      %28 = arith.mulf %27, %24 : vector<128x128xf32>
      %29 = arith.addf %25, %28 : vector<128x128xf32>
      %30 = vector.extract_strided_slice %29 {offsets = [0, 32], sizes = [128, 1], strides = [1, 1]} : vector<128x128xf32> to vector<128x1xf32>
      %31 = tpu.reciprocal %30 {approx = true} : vector<128x1xf32> -> vector<128x1xf32>
      %32 = vector.broadcast %31 : vector<128x1xf32> to vector<128x128xf32>
      %33 = arith.mulf %29, %32 : vector<128x128xf32>
      %cst_21 = arith.constant 0.000000e+00 : f32
      %34 = vector.broadcast %cst_21 : f32 to vector<128x128xf32>
      %35 = arith.cmpf ogt, %33, %34 : vector<128x128xf32>
      %cst_22 = arith.constant 0.000000e+00 : f32
      %36 = vector.broadcast %cst_22 : f32 to vector<128x128xf32>
      %37 = arith.minimumf %33, %36 : vector<128x128xf32>
      %38 = math.exp %37 : vector<128x128xf32>
      %cst_23 = arith.constant 1.000000e+00 : f32
      %39 = vector.broadcast %cst_23 : f32 to vector<128x128xf32>
      %40 = arith.subf %38, %39 : vector<128x128xf32>
      %41 = arith.select %35, %33, %40 : vector<128x128xi1>, vector<128x128xf32>
      %42 = tpu.iota {dimensions = array<i32: 1>} : vector<128x128xi32>
      %c32_i32 = arith.constant 32 : i32
      %43 = vector.broadcast %c32_i32 : i32 to vector<128x128xi32>
      %44 = arith.cmpi eq, %42, %43 : vector<128x128xi32>
      %cst_24 = arith.constant 1.000000e+00 : f32
      %45 = vector.broadcast %cst_24 : f32 to vector<128x128xf32>
      %46 = arith.select %44, %45, %41 : vector<128x128xi1>, vector<128x128xf32>
      %47 = arith.truncf %46 : vector<128x128xf32> to vector<128x128xbf16>
      %c0_25 = arith.constant 0 : index
      %c0_26 = arith.constant 0 : index
      %48 = vector.load %arg8[%c0_25, %c0_26] : memref<128x128xbf16, #tpu.memory_space<vmem>>, vector<128x128xbf16>
      tpu.vector_store %arg8[%c0_25, %c0_26], %47 {strides = array<i32>} : memref<128x128xbf16, #tpu.memory_space<vmem>>, vector<128x128xbf16>,
    } else {
    }
    return
  }
  func.func @transform_0(%arg0: i32, %arg1: i32) -> (i32, i32) {
    %c0_i32 = arith.constant 0 : i32
    return %arg0, %arg1 : i32, i32
  }
  func.func @transform_1(%arg0: i32, %arg1: i32) -> (i32, i32) {
    %c0_i32 = arith.constant 0 : i32
    %c0_i32_0 = arith.constant 0 : i32
    return %arg0, %c0_i32 : i32, i32
  }
  func.func @transform_2(%arg0: i32, %arg1: i32) -> (i32, i32) {
    %c0_i32 = arith.constant 0 : i32
    %c0_i32_0 = arith.constant 0 : i32
    return %arg1, %c0_i32 : i32, i32
  }
  func.func @transform_3(%arg0: i32, %arg1: i32) -> (i32, i32) {
    %c0_i32 = arith.constant 0 : i32
    %c0_i32_0 = arith.constant 0 : i32
    return %arg0, %c0_i32 : i32, i32
  }
  func.func @transform_4(%arg0: i32, %arg1: i32) -> (i32, i32) {
    %c0_i32 = arith.constant 0 : i32
    %c0_i32_0 = arith.constant 0 : i32
    return %c0_i32, %arg1 : i32, i32
  }
  func.func @transform_5(%arg0: i32, %arg1: i32) -> (i32, i32) {
    %c0_i32 = arith.constant 0 : i32
    %c0_i32_0 = arith.constant 0 : i32
    return %arg0, %c0_i32 : i32, i32
  }
  func.func @transform_6(%arg0: i32, %arg1: i32) -> (i32, i32) {
    %c0_i32 = arith.constant 0 : i32
    %c0_i32_0 = arith.constant 0 : i32
    return %arg0, %c0_i32 : i32, i32
  }
}

module attributes {stable_mosaic.version = 11 : i64} {
  func.func @_linear_kernel(%arg0: i32, %arg1: memref<128x128xf32, #tpu.memory_space<vmem>>, %arg2: memref<128x128xf32, #tpu.memory_space<vmem>>, %arg3: memref<1x128xf32, #tpu.memory_space<vmem>>, %arg4: memref<128x128xf32, #tpu.memory_space<vmem>>) attributes {dimension_semantics = [#tpu.dimension_semantics<parallel>], iteration_bounds = array<i64: 1>, scalar_prefetch = 0 : i64, scratch_operands = 0 : i64, tpu.core_type = #tpu.core_type<tc>, window_params = [{transform_indices = @transform_0, window_bounds = array<i64: 128, 128>}, {pipeline_mode = #tpu.pipeline_mode<synchronous>, transform_indices = @transform_1, window_bounds = array<i64: 128, 128>}, {pipeline_mode = #tpu.pipeline_mode<synchronous>, transform_indices = @transform_2, window_bounds = array<i64: 1, 128>}, {transform_indices = @transform_3, window_bounds = array<i64: 128, 128>}]} {
    %c0 = arith.constant 0 : index
    %c0_0 = arith.constant 0 : index
    %0 = vector.load %arg1[%c0, %c0_0] : memref<128x128xf32, #tpu.memory_space<vmem>>, vector<128x128xf32>
    %c0_1 = arith.constant 0 : index
    %c0_2 = arith.constant 0 : index
    %1 = vector.load %arg2[%c0_1, %c0_2] : memref<128x128xf32, #tpu.memory_space<vmem>>, vector<128x128xf32>
    %cst = arith.constant dense<0.000000e+00> : vector<128x128xf32>
    %2 = tpu.matmul %0, %1, %cst {dimension_numbers = #tpu.dot_dimension_numbers<[1], [0], [0], [1], [0, 0, 1, 1], [], []>} : vector<128x128xf32>, vector<128x128xf32>, vector<128x128xf32> -> vector<128x128xf32>
    %c0_3 = arith.constant 0 : index
    %c0_4 = arith.constant 0 : index
    %3 = vector.load %arg3[%c0_3, %c0_4] : memref<1x128xf32, #tpu.memory_space<vmem>>, vector<1x128xf32>
    %4 = vector.broadcast %3 : vector<1x128xf32> to vector<128x128xf32>
    %5 = arith.addf %2, %4 : vector<128x128xf32>
    %c0_5 = arith.constant 0 : index
    %c0_6 = arith.constant 0 : index
    %6 = vector.load %arg4[%c0_5, %c0_6] : memref<128x128xf32, #tpu.memory_space<vmem>>, vector<128x128xf32>
    tpu.vector_store %arg4[%c0_5, %c0_6], %5 {strides = array<i32>} : memref<128x128xf32, #tpu.memory_space<vmem>>, vector<128x128xf32>,
    return
  }
  func.func @transform_0(%arg0: i32) -> (i32, i32) {
    %c0_i32 = arith.constant 0 : i32
    %c0_i32_0 = arith.constant 0 : i32
    return %arg0, %c0_i32 : i32, i32
  }
  func.func @transform_1(%arg0: i32) -> (i32, i32) {
    %c0_i32 = arith.constant 0 : i32
    %c0_i32_0 = arith.constant 0 : i32
    %c0_i32_1 = arith.constant 0 : i32
    return %c0_i32, %c0_i32_0 : i32, i32
  }
  func.func @transform_2(%arg0: i32) -> (i32, i32) {
    %c0_i32 = arith.constant 0 : i32
    %c0_i32_0 = arith.constant 0 : i32
    %c0_i32_1 = arith.constant 0 : i32
    return %c0_i32, %c0_i32_0 : i32, i32
  }
  func.func @transform_3(%arg0: i32) -> (i32, i32) {
    %c0_i32 = arith.constant 0 : i32
    %c0_i32_0 = arith.constant 0 : i32
    return %arg0, %c0_i32 : i32, i32
  }
}

</mosaic_0001>

<bundles_post_ra>
// kernel: gtan_forward.6
= control target key start
LH: loop header
LB: loop body
LE: loop exit
PB: predicated region body
PF: predicated region fallthrough
CT: control target
= control target key end

     0   :  { %v214_v40 = vlaneseq  ;;  %s610_s1 = inlined_call_operand.vmem [shape: f32[128,128], index: 1, kind: input, shape index: {}]   ;;  %s611_s0 = inlined_call_operand.vmem [shape: f32[128,128], index: 0, kind: input, shape index: {}]   ;;  %s612_s2 = inlined_call_operand.vmem [shape: f32[1,128], index: 2, kind: input, shape index: {}]   ;;  %s613_s3 = inlined_call_operand.vmem [shape: f32[128,128], index: 3, kind: output, shape index: {}]  }
   0x1   :  { %v30_v0 = vld [vmem:[%s610_s1] sm:$0xff]  ;;  %v31_v1 = vld [vmem:[%s610_s1 + $0x8] sm:$0xff]  ;;  %v32_v2 = vld [vmem:[%s610_s1 + $0x10] sm:$0xff] }
   0x2   :  { %v342_v3 = vpack.c.bf16 %v31_v1, %v30_v0  ;;  %v33_v4 = vld [vmem:[%s610_s1 + $0x18] sm:$0xff]  ;;  %v34_v6 = vld [vmem:[%s610_s1 + $0x20] sm:$0xff]  ;;  %v35_v7 = vld [vmem:[%s610_s1 + $0x28] sm:$0xff]  ;;  %v511_v42 = vand.u32 127, %v214_v40 }
   0x3   :  { %v346_v5 = vpack.c.bf16 %v33_v4, %v32_v2  ;;  %v350_v8 = vpack.c.bf16 %v35_v7, %v34_v6  ;;  %v14_v9 = vld [vmem:[%s611_s0] sm:$0xff]  ;;  %v36_v11 = vld [vmem:[%s610_s1 + $0x30] sm:$0xff]  ;;  %v37_v12 = vld [vmem:[%s610_s1 + $0x38] sm:$0xff] }
   0x4   :  { %343 = vmatprep.subr.bf16.mxu0 %v342_v3  ;;  %374 = vmatprep.subr.bf16.mxu1 %v342_v3  ;;  %v22_v10 = vld [vmem:[%s611_s0 + $0x40] sm:$0xff]  ;;  %v354_v13 = vpack.c.bf16 %v37_v12, %v36_v11  ;;  %v39_v15 = vld [vmem:[%s610_s1 + $0x48] sm:$0xff]  ;;  %v40_v17 = vld [vmem:[%s610_s1 + $0x50] sm:$0xff]  ;;  %vm216_vm0 = vcmp.eq.s32.totalorder %v511_v42, 32 }
   0x5   :  { %345 = vmatpush3.bf16.msra.mxu0 %v342_v3  ;;  %382 = vmatpush3.bf16.msra.mxu1 %v342_v3  ;;  %v38_v14 = vld [vmem:[%s610_s1 + $0x40] sm:$0xff]  ;;  %v41_v18 = vld [vmem:[%s610_s1 + $0x58] sm:$0xff]  ;;  %v43_v21 = vld [vmem:[%s610_s1 + $0x68] sm:$0xff] }
   0x6   :  { %347 = vmatprep.subr.bf16.mxu0 %v346_v5  ;;  %375 = vmatprep.subr.bf16.mxu1 %v346_v5  ;;  %v358_v16 = vpack.c.bf16 %v39_v15, %v38_v14  ;;  %v362_v19 = vpack.c.bf16 %v41_v18, %v40_v17  ;;  %v42_v20 = vld [vmem:[%s610_s1 + $0x60] sm:$0xff]  ;;  %v44_v23 = vld [vmem:[%s610_s1 + $0x70] sm:$0xff]  ;;  %v45_v24 = vld [vmem:[%s610_s1 + $0x78] sm:$0xff] }
   0x7   :  { %318 = vmatprep.mubr.f32.mxu0 %v14_v9  ;;  %330 = vmatprep.mubr.f32.mxu1 %v22_v10  ;;  %v366_v22 = vpack.c.bf16 %v43_v21, %v42_v20  ;;  %v370_v25 = vpack.c.bf16 %v45_v24, %v44_v23  ;;  %v15_v26 = vld [vmem:[%s611_s0 + $0x8] sm:$0xff]  ;;  %v16_v28 = vld [vmem:[%s611_s0 + $0x10] sm:$0xff]  ;;  %v17_v30 = vld [vmem:[%s611_s0 + $0x18] sm:$0xff] }
   0x8   :  { %v23_v27 = vld [vmem:[%s611_s0 + $0x48] sm:$0xff]  ;;  %v24_v29 = vld [vmem:[%s611_s0 + $0x50] sm:$0xff]  ;;  %v25_v31 = vld [vmem:[%s611_s0 + $0x58] sm:$0xff] }
   0x9   :  { %349 = vmatpush3.bf16.msra.mxu0 %v346_v5  ;;  %383 = vmatpush3.bf16.msra.mxu1 %v346_v5  ;;  %v18_v32 = vld [vmem:[%s611_s0 + $0x20] sm:$0xff]  ;;  %v19_v34 = vld [vmem:[%s611_s0 + $0x28] sm:$0xff]  ;;  %v20_v36 = vld [vmem:[%s611_s0 + $0x30] sm:$0xff] }
   0xa   :  { %351 = vmatprep.subr.bf16.mxu0 %v350_v8  ;;  %376 = vmatprep.subr.bf16.mxu1 %v350_v8  ;;  %v26_v33 = vld [vmem:[%s611_s0 + $0x60] sm:$0xff]  ;;  %v27_v35 = vld [vmem:[%s611_s0 + $0x68] sm:$0xff]  ;;  %v28_v37 = vld [vmem:[%s611_s0 + $0x70] sm:$0xff] }
   0xb   :  { %v21_v38 = vld [vmem:[%s611_s0 + $0x38] sm:$0xff]  ;;  %v509_v41 = vld [vmem:[%s612_s2] ss:$0 sm:$0xff] }
   0xc   :  { %v29_v39 = vld [vmem:[%s611_s0 + $0x78] sm:$0xff] }
   0xd   :  { %353 = vmatpush3.bf16.msra.mxu0 %v350_v8  ;;  %384 = vmatpush3.bf16.msra.mxu1 %v350_v8 }
   0xe   :  { %355 = vmatprep.subr.bf16.mxu0 %v354_v13  ;;  %377 = vmatprep.subr.bf16.mxu1 %v354_v13 }
  0x11   :  { %357 = vmatpush3.bf16.msra.mxu0 %v354_v13  ;;  %385 = vmatpush3.bf16.msra.mxu1 %v354_v13 }
  0x12   :  { %359 = vmatprep.subr.bf16.mxu0 %v358_v16  ;;  %378 = vmatprep.subr.bf16.mxu1 %v358_v16 }
  0x15   :  { %361 = vmatpush3.bf16.msra.mxu0 %v358_v16  ;;  %386 = vmatpush3.bf16.msra.mxu1 %v358_v16 }
  0x16   :  { %363 = vmatprep.subr.bf16.mxu0 %v362_v19  ;;  %379 = vmatprep.subr.bf16.mxu1 %v362_v19 }
  0x19   :  { %365 = vmatpush3.bf16.msra.mxu0 %v362_v19  ;;  %387 = vmatpush3.bf16.msra.mxu1 %v362_v19 }
  0x1a   :  { %367 = vmatprep.subr.bf16.mxu0 %v366_v22  ;;  %380 = vmatprep.subr.bf16.mxu1 %v366_v22 }
  0x1d   :  { %369 = vmatpush3.bf16.msra.mxu0 %v366_v22  ;;  %388 = vmatpush3.bf16.msra.mxu1 %v366_v22 }
  0x1e   :  { %371 = vmatprep.subr.bf16.mxu0 %v370_v25  ;;  %381 = vmatprep.subr.bf16.mxu1 %v370_v25 }
  0x21   :  { %373 = vmatpush3.bf16.msra.mxu0 %v370_v25  ;;  %389 = vmatpush3.bf16.msra.mxu1 %v370_v25 }
  0x24   :  { %319 = vmatmul.mubr.f32.vlgmr.msra.gmra.mrb[0].mxu0 %v15_v26  ;;  %331 = vmatmul.mubr.f32.vlgmr.msra.gmra.mrb[0].mxu1 %v23_v27 }
  0x25   :  { %321 = vmatprep.mubr.f32.mxu0 %v16_v28  ;;  %333 = vmatprep.mubr.f32.mxu1 %v24_v29 }
  0x28   :  { %322 = vmatmul.mubr.f32.gmra.mrb[2].mxu0 %v17_v30  ;;  %334 = vmatmul.mubr.f32.gmra.mrb[2].mxu1 %v25_v31 }
  0x29   :  { %324 = vmatprep.mubr.f32.mxu0 %v18_v32  ;;  %336 = vmatprep.mubr.f32.mxu1 %v26_v33 }
  0x2c   :  { %325 = vmatmul.mubr.f32.gmra.mrb[4].mxu0 %v19_v34  ;;  %337 = vmatmul.mubr.f32.gmra.mrb[4].mxu1 %v27_v35 }
  0x2d   :  { %327 = vmatprep.mubr.f32.mxu0 %v20_v36  ;;  %339 = vmatprep.mubr.f32.mxu1 %v28_v37 }
  0x30   :  { %328 = vmatmul.mubr.f32.gmra.mrb[6].mxu0 %v21_v38  ;;  %340 = vmatmul.mubr.f32.gmra.mrb[6].mxu1 %v29_v39 }
  0xf7   :  { %v320_v43 = vpop.f32.mrb[0].mxu0  ;;  %v332_v44 = vpop.f32.mrb[0].mxu1 }
  0xf8   :  { %v125_v45 = vadd.f32 %v320_v43, %v509_v41  ;;  %v165_v46 = vadd.f32 %v332_v44, %v509_v41  ;;  %v119_v47 = vpop.f32.mrb[1].mxu0  ;;  %v159_v48 = vpop.f32.mrb[1].mxu1 }
  0xf9   :  { %v120_v49 = vadd.f32 %v509_v41, %v119_v47  ;;  %v160_v50 = vadd.f32 %v509_v41, %v159_v48 }
  0xfa   :  { %v199_v51 = vmax.f32 %v125_v45, 0.0  ;;  %v207_v52 = vmax.f32 %v165_v46, 0.0 }
  0xfb   :  { %v198_v53 = vmax.f32 %v120_v49, 0.0  ;;  %v206_v54 = vmax.f32 %v160_v50, 0.0  ;;  %v323_v55 = vpop.f32.mrb[2].mxu0  ;;  %v335_v56 = vpop.f32.mrb[2].mxu1 }
  0xfc   :  { %v218_v57 = vsel %vm216_vm0, 1.0, %v199_v51  ;;  %v226_v58 = vsel %vm216_vm0, 1.0, %v207_v52  ;;  %v135_v59 = vadd.f32 %v323_v55, %v509_v41  ;;  %v175_v60 = vadd.f32 %v335_v56, %v509_v41  ;;  %v129_v61 = vpop.f32.mrb[3].mxu0  ;;  %v169_v62 = vpop.f32.mrb[3].mxu1 }
  0xfd   :  { %234 = vst [vmem:[%s613_s3 + $0x8] sm:$0xff] %v218_v57  ;;  %242 = vst [vmem:[%s613_s3 + $0x48] sm:$0xff] %v226_v58  ;;  %v217_v63 = vsel %vm216_vm0, 1.0, %v198_v53  ;;  %v225_v0 = vsel %vm216_vm0, 1.0, %v206_v54  ;;  %v130_v1 = vadd.f32 %v509_v41, %v129_v61  ;;  %v170_v2 = vadd.f32 %v509_v41, %v169_v62 }
  0xfe   :  { %233 = vst [vmem:[%s613_s3] sm:$0xff] %v217_v63  ;;  %241 = vst [vmem:[%s613_s3 + $0x40] sm:$0xff] %v225_v0  ;;  %v201_v3 = vmax.f32 %v135_v59, 0.0  ;;  %v209_v4 = vmax.f32 %v175_v60, 0.0 }
  0xff   :  { %v200_v5 = vmax.f32 %v130_v1, 0.0  ;;  %v208_v6 = vmax.f32 %v170_v2, 0.0  ;;  %v326_v7 = vpop.f32.mrb[4].mxu0  ;;  %v338_v8 = vpop.f32.mrb[4].mxu1 }
 0x100   :  { %v220_v9 = vsel %vm216_vm0, 1.0, %v201_v3  ;;  %v228_v10 = vsel %vm216_vm0, 1.0, %v209_v4  ;;  %v145_v11 = vadd.f32 %v326_v7, %v509_v41  ;;  %v185_v12 = vadd.f32 %v338_v8, %v509_v41  ;;  %v139_v13 = vpop.f32.mrb[5].mxu0  ;;  %v179_v14 = vpop.f32.mrb[5].mxu1 }
 0x101   :  { %236 = vst [vmem:[%s613_s3 + $0x18] sm:$0xff] %v220_v9  ;;  %244 = vst [vmem:[%s613_s3 + $0x58] sm:$0xff] %v228_v10  ;;  %v219_v15 = vsel %vm216_vm0, 1.0, %v200_v5  ;;  %v227_v16 = vsel %vm216_vm0, 1.0, %v208_v6  ;;  %v140_v17 = vadd.f32 %v509_v41, %v139_v13  ;;  %v180_v18 = vadd.f32 %v509_v41, %v179_v14 }
 0x102   :  { %235 = vst [vmem:[%s613_s3 + $0x10] sm:$0xff] %v219_v15  ;;  %243 = vst [vmem:[%s613_s3 + $0x50] sm:$0xff] %v227_v16  ;;  %v203_v19 = vmax.f32 %v145_v11, 0.0  ;;  %v211_v20 = vmax.f32 %v185_v12, 0.0 }
 0x103   :  { %v202_v21 = vmax.f32 %v140_v17, 0.0  ;;  %v210_v22 = vmax.f32 %v180_v18, 0.0  ;;  %v329_v23 = vpop.f32.mrb[6].mxu0  ;;  %v341_v24 = vpop.f32.mrb[6].mxu1 }
 0x104   :  { %v222_v25 = vsel %vm216_vm0, 1.0, %v203_v19  ;;  %v230_v26 = vsel %vm216_vm0, 1.0, %v211_v20  ;;  %v155_v27 = vadd.f32 %v329_v23, %v509_v41  ;;  %v195_v28 = vadd.f32 %v341_v24, %v509_v41  ;;  %v149_v29 = vpop.f32.mrb[7].mxu0  ;;  %v189_v30 = vpop.f32.mrb[7].mxu1 }
 0x105   :  { %238 = vst [vmem:[%s613_s3 + $0x28] sm:$0xff] %v222_v25  ;;  %246 = vst [vmem:[%s613_s3 + $0x68] sm:$0xff] %v230_v26  ;;  %v221_v31 = vsel %vm216_vm0, 1.0, %v202_v21  ;;  %v229_v32 = vsel %vm216_vm0, 1.0, %v210_v22  ;;  %v150_v33 = vadd.f32 %v509_v41, %v149_v29  ;;  %v190_v34 = vadd.f32 %v509_v41, %v189_v30 }
 0x106   :  { %237 = vst [vmem:[%s613_s3 + $0x20] sm:$0xff] %v221_v31  ;;  %245 = vst [vmem:[%s613_s3 + $0x60] sm:$0xff] %v229_v32  ;;  %v205_v35 = vmax.f32 %v155_v27, 0.0  ;;  %v213_v36 = vmax.f32 %v195_v28, 0.0 }
 0x107   :  { %v204_v37 = vmax.f32 %v150_v33, 0.0  ;;  %v212_v38 = vmax.f32 %v190_v34, 0.0 }
 0x108   :  { %v224_v39 = vsel %vm216_vm0, 1.0, %v205_v35  ;;  %v232_v40 = vsel %vm216_vm0, 1.0, %v213_v36 }
 0x109   :  { %240 = vst [vmem:[%s613_s3 + $0x38] sm:$0xff] %v224_v39  ;;  %248 = vst [vmem:[%s613_s3 + $0x78] sm:$0xff] %v232_v40  ;;  %v223_v41 = vsel %vm216_vm0, 1.0, %v204_v37  ;;  %v231_v43 = vsel %vm216_vm0, 1.0, %v212_v38 }
 0x10a   :  { %239 = vst [vmem:[%s613_s3 + $0x30] sm:$0xff] %v223_v41  ;;  %247 = vst [vmem:[%s613_s3 + $0x70] sm:$0xff] %v231_v43 }

// kernel: gtan_forward.11
= control target key start
LH: loop header
LB: loop body
LE: loop exit
PB: predicated region body
PF: predicated region fallthrough
CT: control target
= control target key end

     0   :  { %s522_s1 = inlined_call_operand.vmem [shape: f32[128,128], index: 1, kind: input, shape index: {}]   ;;  %s523_s0 = inlined_call_operand.vmem [shape: f32[128,128], index: 0, kind: input, shape index: {}]   ;;  %s524_s2 = inlined_call_operand.vmem [shape: f32[1,128], index: 2, kind: input, shape index: {}]   ;;  %s525_s3 = inlined_call_operand.vmem [shape: f32[128,128], index: 3, kind: output, shape index: {}]  }
   0x1   :  { %v30_v0 = vld [vmem:[%s522_s1] sm:$0xff]  ;;  %v31_v1 = vld [vmem:[%s522_s1 + $0x8] sm:$0xff]  ;;  %v32_v2 = vld [vmem:[%s522_s1 + $0x10] sm:$0xff] }
   0x2   :  { %v307_v3 = vpack.c.bf16 %v31_v1, %v30_v0  ;;  %v33_v4 = vld [vmem:[%s522_s1 + $0x18] sm:$0xff]  ;;  %v34_v6 = vld [vmem:[%s522_s1 + $0x20] sm:$0xff]  ;;  %v35_v7 = vld [vmem:[%s522_s1 + $0x28] sm:$0xff] }
   0x3   :  { %v311_v5 = vpack.c.bf16 %v33_v4, %v32_v2  ;;  %v315_v8 = vpack.c.bf16 %v35_v7, %v34_v6  ;;  %v14_v9 = vld [vmem:[%s523_s0] sm:$0xff]  ;;  %v36_v11 = vld [vmem:[%s522_s1 + $0x30] sm:$0xff]  ;;  %v37_v12 = vld [vmem:[%s522_s1 + $0x38] sm:$0xff] }
   0x4   :  { %308 = vmatprep.subr.bf16.mxu0 %v307_v3  ;;  %339 = vmatprep.subr.bf16.mxu1 %v307_v3  ;;  %v22_v10 = vld [vmem:[%s523_s0 + $0x40] sm:$0xff]  ;;  %v319_v13 = vpack.c.bf16 %v37_v12, %v36_v11  ;;  %v39_v15 = vld [vmem:[%s522_s1 + $0x48] sm:$0xff]  ;;  %v40_v17 = vld [vmem:[%s522_s1 + $0x50] sm:$0xff] }
   0x5   :  { %310 = vmatpush3.bf16.msra.mxu0 %v307_v3  ;;  %347 = vmatpush3.bf16.msra.mxu1 %v307_v3  ;;  %v38_v14 = vld [vmem:[%s522_s1 + $0x40] sm:$0xff]  ;;  %v41_v18 = vld [vmem:[%s522_s1 + $0x58] sm:$0xff]  ;;  %v43_v21 = vld [vmem:[%s522_s1 + $0x68] sm:$0xff] }
   0x6   :  { %312 = vmatprep.subr.bf16.mxu0 %v311_v5  ;;  %340 = vmatprep.subr.bf16.mxu1 %v311_v5  ;;  %v323_v16 = vpack.c.bf16 %v39_v15, %v38_v14  ;;  %v327_v19 = vpack.c.bf16 %v41_v18, %v40_v17  ;;  %v42_v20 = vld [vmem:[%s522_s1 + $0x60] sm:$0xff]  ;;  %v44_v23 = vld [vmem:[%s522_s1 + $0x70] sm:$0xff]  ;;  %v45_v24 = vld [vmem:[%s522_s1 + $0x78] sm:$0xff] }
   0x7   :  { %283 = vmatprep.mubr.f32.mxu0 %v14_v9  ;;  %295 = vmatprep.mubr.f32.mxu1 %v22_v10  ;;  %v331_v22 = vpack.c.bf16 %v43_v21, %v42_v20  ;;  %v335_v25 = vpack.c.bf16 %v45_v24, %v44_v23  ;;  %v15_v26 = vld [vmem:[%s523_s0 + $0x8] sm:$0xff]  ;;  %v16_v28 = vld [vmem:[%s523_s0 + $0x10] sm:$0xff]  ;;  %v17_v30 = vld [vmem:[%s523_s0 + $0x18] sm:$0xff] }
   0x8   :  { %v23_v27 = vld [vmem:[%s523_s0 + $0x48] sm:$0xff]  ;;  %v24_v29 = vld [vmem:[%s523_s0 + $0x50] sm:$0xff]  ;;  %v25_v31 = vld [vmem:[%s523_s0 + $0x58] sm:$0xff] }
   0x9   :  { %314 = vmatpush3.bf16.msra.mxu0 %v311_v5  ;;  %348 = vmatpush3.bf16.msra.mxu1 %v311_v5  ;;  %v18_v32 = vld [vmem:[%s523_s0 + $0x20] sm:$0xff]  ;;  %v19_v34 = vld [vmem:[%s523_s0 + $0x28] sm:$0xff]  ;;  %v20_v36 = vld [vmem:[%s523_s0 + $0x30] sm:$0xff] }
   0xa   :  { %316 = vmatprep.subr.bf16.mxu0 %v315_v8  ;;  %341 = vmatprep.subr.bf16.mxu1 %v315_v8  ;;  %v26_v33 = vld [vmem:[%s523_s0 + $0x60] sm:$0xff]  ;;  %v27_v35 = vld [vmem:[%s523_s0 + $0x68] sm:$0xff]  ;;  %v28_v37 = vld [vmem:[%s523_s0 + $0x70] sm:$0xff] }
   0xb   :  { %v21_v38 = vld [vmem:[%s523_s0 + $0x38] sm:$0xff]  ;;  %v218_v40 = vld [vmem:[%s524_s2] ss:$0 sm:$0xff] }
   0xc   :  { %v29_v39 = vld [vmem:[%s523_s0 + $0x78] sm:$0xff] }
   0xd   :  { %318 = vmatpush3.bf16.msra.mxu0 %v315_v8  ;;  %349 = vmatpush3.bf16.msra.mxu1 %v315_v8 }
   0xe   :  { %320 = vmatprep.subr.bf16.mxu0 %v319_v13  ;;  %342 = vmatprep.subr.bf16.mxu1 %v319_v13 }
  0x11   :  { %322 = vmatpush3.bf16.msra.mxu0 %v319_v13  ;;  %350 = vmatpush3.bf16.msra.mxu1 %v319_v13 }
  0x12   :  { %324 = vmatprep.subr.bf16.mxu0 %v323_v16  ;;  %343 = vmatprep.subr.bf16.mxu1 %v323_v16 }
  0x15   :  { %326 = vmatpush3.bf16.msra.mxu0 %v323_v16  ;;  %351 = vmatpush3.bf16.msra.mxu1 %v323_v16 }
  0x16   :  { %328 = vmatprep.subr.bf16.mxu0 %v327_v19  ;;  %344 = vmatprep.subr.bf16.mxu1 %v327_v19 }
  0x19   :  { %330 = vmatpush3.bf16.msra.mxu0 %v327_v19  ;;  %352 = vmatpush3.bf16.msra.mxu1 %v327_v19 }
  0x1a   :  { %332 = vmatprep.subr.bf16.mxu0 %v331_v22  ;;  %345 = vmatprep.subr.bf16.mxu1 %v331_v22 }
  0x1d   :  { %334 = vmatpush3.bf16.msra.mxu0 %v331_v22  ;;  %353 = vmatpush3.bf16.msra.mxu1 %v331_v22 }
  0x1e   :  { %336 = vmatprep.subr.bf16.mxu0 %v335_v25  ;;  %346 = vmatprep.subr.bf16.mxu1 %v335_v25 }
  0x21   :  { %338 = vmatpush3.bf16.msra.mxu0 %v335_v25  ;;  %354 = vmatpush3.bf16.msra.mxu1 %v335_v25 }
  0x24   :  { %284 = vmatmul.mubr.f32.vlgmr.msra.gmra.mrb[0].mxu0 %v15_v26  ;;  %296 = vmatmul.mubr.f32.vlgmr.msra.gmra.mrb[0].mxu1 %v23_v27 }
  0x25   :  { %286 = vmatprep.mubr.f32.mxu0 %v16_v28  ;;  %298 = vmatprep.mubr.f32.mxu1 %v24_v29 }
  0x28   :  { %287 = vmatmul.mubr.f32.gmra.mrb[2].mxu0 %v17_v30  ;;  %299 = vmatmul.mubr.f32.gmra.mrb[2].mxu1 %v25_v31 }
  0x29   :  { %289 = vmatprep.mubr.f32.mxu0 %v18_v32  ;;  %301 = vmatprep.mubr.f32.mxu1 %v26_v33 }
  0x2c   :  { %290 = vmatmul.mubr.f32.gmra.mrb[4].mxu0 %v19_v34  ;;  %302 = vmatmul.mubr.f32.gmra.mrb[4].mxu1 %v27_v35 }
  0x2d   :  { %292 = vmatprep.mubr.f32.mxu0 %v20_v36  ;;  %304 = vmatprep.mubr.f32.mxu1 %v28_v37 }
  0x30   :  { %293 = vmatmul.mubr.f32.gmra.mrb[6].mxu0 %v21_v38  ;;  %305 = vmatmul.mubr.f32.gmra.mrb[6].mxu1 %v29_v39 }
  0xf7   :  { %v285_v41 = vpop.f32.mrb[0].mxu0  ;;  %v297_v42 = vpop.f32.mrb[0].mxu1 }
  0xf8   :  { %v125_v43 = vadd.f32 %v285_v41, %v218_v40  ;;  %v165_v44 = vadd.f32 %v297_v42, %v218_v40  ;;  %v119_v45 = vpop.f32.mrb[1].mxu0  ;;  %v159_v46 = vpop.f32.mrb[1].mxu1 }
  0xf9   :  { %v120_v47 = vadd.f32 %v218_v40, %v119_v45  ;;  %v160_v48 = vadd.f32 %v218_v40, %v159_v46 }
  0xfa   :  { %199 = vst [vmem:[%s525_s3 + $0x8] sm:$0xff] %v125_v43  ;;  %207 = vst [vmem:[%s525_s3 + $0x48] sm:$0xff] %v165_v44 }
  0xfb   :  { %198 = vst [vmem:[%s525_s3] sm:$0xff] %v120_v47  ;;  %206 = vst [vmem:[%s525_s3 + $0x40] sm:$0xff] %v160_v48  ;;  %v288_v49 = vpop.f32.mrb[2].mxu0  ;;  %v300_v50 = vpop.f32.mrb[2].mxu1 }
  0xfc   :  { %v135_v51 = vadd.f32 %v288_v49, %v218_v40  ;;  %v175_v52 = vadd.f32 %v300_v50, %v218_v40  ;;  %v129_v53 = vpop.f32.mrb[3].mxu0  ;;  %v169_v54 = vpop.f32.mrb[3].mxu1 }
  0xfd   :  { %v130_v55 = vadd.f32 %v218_v40, %v129_v53  ;;  %v170_v56 = vadd.f32 %v218_v40, %v169_v54 }
  0xfe   :  { %201 = vst [vmem:[%s525_s3 + $0x18] sm:$0xff] %v135_v51  ;;  %209 = vst [vmem:[%s525_s3 + $0x58] sm:$0xff] %v175_v52 }
  0xff   :  { %200 = vst [vmem:[%s525_s3 + $0x10] sm:$0xff] %v130_v55  ;;  %208 = vst [vmem:[%s525_s3 + $0x50] sm:$0xff] %v170_v56  ;;  %v291_v57 = vpop.f32.mrb[4].mxu0  ;;  %v303_v58 = vpop.f32.mrb[4].mxu1 }
 0x100   :  { %v145_v59 = vadd.f32 %v291_v57, %v218_v40  ;;  %v185_v60 = vadd.f32 %v303_v58, %v218_v40  ;;  %v139_v61 = vpop.f32.mrb[5].mxu0  ;;  %v179_v62 = vpop.f32.mrb[5].mxu1 }
 0x101   :  { %v140_v63 = vadd.f32 %v218_v40, %v139_v61  ;;  %v180_v0 = vadd.f32 %v218_v40, %v179_v62 }
 0x102   :  { %203 = vst [vmem:[%s525_s3 + $0x28] sm:$0xff] %v145_v59  ;;  %211 = vst [vmem:[%s525_s3 + $0x68] sm:$0xff] %v185_v60 }
 0x103   :  { %202 = vst [vmem:[%s525_s3 + $0x20] sm:$0xff] %v140_v63  ;;  %210 = vst [vmem:[%s525_s3 + $0x60] sm:$0xff] %v180_v0  ;;  %v294_v1 = vpop.f32.mrb[6].mxu0  ;;  %v306_v2 = vpop.f32.mrb[6].mxu1 }
 0x104   :  { %v155_v3 = vadd.f32 %v294_v1, %v218_v40  ;;  %v195_v4 = vadd.f32 %v306_v2, %v218_v40  ;;  %v149_v5 = vpop.f32.mrb[7].mxu0  ;;  %v189_v6 = vpop.f32.mrb[7].mxu1 }
 0x105   :  { %v150_v7 = vadd.f32 %v218_v40, %v149_v5  ;;  %v190_v8 = vadd.f32 %v218_v40, %v189_v6 }
 0x106   :  { %205 = vst [vmem:[%s525_s3 + $0x38] sm:$0xff] %v155_v3  ;;  %213 = vst [vmem:[%s525_s3 + $0x78] sm:$0xff] %v195_v4 }
 0x107   :  { %204 = vst [vmem:[%s525_s3 + $0x30] sm:$0xff] %v150_v7  ;;  %212 = vst [vmem:[%s525_s3 + $0x70] sm:$0xff] %v190_v8 }

// kernel: gtan_forward.7
= control target key start
LH: loop header
LB: loop body
LE: loop exit
PB: predicated region body
PF: predicated region fallthrough
CT: control target
= control target key end

     0   :  { %v1248_v0 = vmov 0   ;;  %s1716_s3 = inlined_call_operand.vmem [shape: f32[128,1], index: 3, kind: input, shape index: {}]   ;;  %s1717_s2 = inlined_call_operand.vmem [shape: bf16[128,128], index: 2, kind: input, shape index: {}]   ;;  %s1718_s5 = inlined_call_operand.vmem [shape: f32[128,1], index: 5, kind: input, shape index: {}]   ;;  %s1719_s4 = inlined_call_operand.vmem [shape: f32[1,128], index: 4, kind: input, shape index: {}]   ;;  %s1720_s0 = inlined_call_operand.vmem [shape: s8[128,128], index: 0, kind: input, shape index: {}]   ;;  %s1721_s1 = inlined_call_operand.vmem [shape: f32[128,128], index: 1, kind: input, shape index: {}]   ;;  %s1722_s6 = inlined_call_operand.vmem [shape: bf16[128,128], index: 6, kind: output, shape index: {}]  }
   0x1   :  { %1141 = vset.pattern.permute.xlu1 %v1248_v0  ;;  %1140 = vset.pattern.permute.xlu0 %v1248_v0  ;;  %v52_v1 = vld [vmem:[%s1716_s3 + $0x40] sm:$0xff]  ;;  %v53_v3 = vld [vmem:[%s1716_s3 + $0x48] sm:$0xff]  ;;  %v47_v5 = vld [vmem:[%s1716_s3 + $0x18] sm:$0xff] }
   0x2   :  { %v44_v2 = vld [vmem:[%s1716_s3] sm:$0xff]  ;;  %103 = vperm.xlu1 %1141, %v52_v1   ;;  %v45_v4 = vld [vmem:[%s1716_s3 + $0x8] sm:$0xff]  ;;  %v46_v6 = vld [vmem:[%s1716_s3 + $0x10] sm:$0xff] }
   0x3   :  { %63 = vperm.xlu0 %1140, %v44_v2   ;;  %v55_v7 = vld [vmem:[%s1716_s3 + $0x58] sm:$0xff]  ;;  %v54_v8 = vld [vmem:[%s1716_s3 + $0x50] sm:$0xff]  ;;  %v1144_v9 = vld [vmem:[%s1717_s2] sm:$0xff]  }
   0x4   :  { %v1145_v10 = vld [vmem:[%s1717_s2 + $0x8] sm:$0xff]   ;;  %v48_v12 = vld [vmem:[%s1716_s3 + $0x20] sm:$0xff]  ;;  %1090 = vmatprep.subr.bf16.mxu0 %v1144_v9  ;;  %1122 = vmatprep.subr.bf16.mxu1 %v1144_v9  ;;  %v1146_v13 = vld [vmem:[%s1717_s2 + $0x10] sm:$0xff]  }
   0x5   :  { %v49_v11 = vld [vmem:[%s1716_s3 + $0x28] sm:$0xff]  ;;  %1091 = vmatpush3.bf16.msra.mxu0 %v1144_v9  ;;  %1130 = vmatpush3.bf16.msra.mxu1 %v1144_v9  ;;  %v56_v15 = vld [vmem:[%s1716_s3 + $0x60] sm:$0xff]  ;;  %v1147_v16 = vld [vmem:[%s1717_s2 + $0x18] sm:$0xff]  }
   0x6   :  { %108 = vperm.xlu1 %1141, %v53_v3   ;;  %1092 = vmatprep.subr.bf16.mxu0 %v1145_v10  ;;  %v57_v14 = vld [vmem:[%s1716_s3 + $0x68] sm:$0xff]  ;;  %v51_v17 = vld [vmem:[%s1716_s3 + $0x38] sm:$0xff]  ;;  %v50_v18 = vld [vmem:[%s1716_s3 + $0x30] sm:$0xff] }
   0x7   :  { %68 = vperm.xlu0 %1140, %v45_v4   ;;  %1123 = vmatprep.subr.bf16.mxu1 %v1145_v10  ;;  %v1148_v19 = vld [vmem:[%s1717_s2 + $0x20] sm:$0xff]   ;;  %v59_v20 = vld [vmem:[%s1716_s3 + $0x78] sm:$0xff]  ;;  %v58_v21 = vld [vmem:[%s1716_s3 + $0x70] sm:$0xff] }
   0x8   :  { %v1149_v22 = vld [vmem:[%s1717_s2 + $0x28] sm:$0xff]   ;;  %v531_v24 = vld [vmem:[%s1718_s5] sm:$0xff]  ;;  %v1150_v25 = vld [vmem:[%s1717_s2 + $0x30] sm:$0xff]  }
   0x9   :  { %1093 = vmatpush3.bf16.msra.mxu0 %v1145_v10  ;;  %1131 = vmatpush3.bf16.msra.mxu1 %v1145_v10  ;;  %v532_v23 = vld [vmem:[%s1718_s5 + $0x8] sm:$0xff]  ;;  %v534_v26 = vld [vmem:[%s1718_s5 + $0x18] sm:$0xff]  ;;  %v533_v27 = vld [vmem:[%s1718_s5 + $0x10] sm:$0xff] }
   0xa   :  { %78 = vperm.xlu1 %1141, %v47_v5   ;;  %1094 = vmatprep.subr.bf16.mxu0 %v1146_v13  ;;  %v1151_v28 = vld [vmem:[%s1717_s2 + $0x38] sm:$0xff]   ;;  %v536_v29 = vld [vmem:[%s1718_s5 + $0x28] sm:$0xff]  ;;  %v535_v30 = vld [vmem:[%s1718_s5 + $0x20] sm:$0xff] }
   0xb   :  { %73 = vperm.xlu0 %1140, %v46_v6   ;;  %1124 = vmatprep.subr.bf16.mxu1 %v1146_v13  ;;  %v538_v31 = vld [vmem:[%s1718_s5 + $0x38] sm:$0xff]  ;;  %v537_v32 = vld [vmem:[%s1718_s5 + $0x30] sm:$0xff]  ;;  %v540_v33 = vld [vmem:[%s1718_s5 + $0x48] sm:$0xff] }
   0xc   :  { %v539_v34 = vld [vmem:[%s1718_s5 + $0x40] sm:$0xff]  ;;  %v542_v35 = vld [vmem:[%s1718_s5 + $0x58] sm:$0xff]  ;;  %v541_v36 = vld [vmem:[%s1718_s5 + $0x50] sm:$0xff] }
   0xd   :  { %1095 = vmatpush3.bf16.msra.mxu0 %v1146_v13  ;;  %1132 = vmatpush3.bf16.msra.mxu1 %v1146_v13  ;;  %v544_v37 = vld [vmem:[%s1718_s5 + $0x68] sm:$0xff]  ;;  %v543_v38 = vld [vmem:[%s1718_s5 + $0x60] sm:$0xff]  ;;  %v546_v39 = vld [vmem:[%s1718_s5 + $0x78] sm:$0xff] }
   0xe   :  { %118 = vperm.xlu1 %1141, %v55_v7   ;;  %1096 = vmatprep.subr.bf16.mxu0 %v1147_v16  ;;  %v545_v40 = vld [vmem:[%s1718_s5 + $0x70] sm:$0xff]  ;;  %v1408_v41 = vld [vmem:[%s1719_s4] ss:$0 sm:$0xff] }
   0xf   :  { %113 = vperm.xlu0 %1140, %v54_v8   ;;  %1125 = vmatprep.subr.bf16.mxu1 %v1147_v16  ;;  %v227_v63 = vld [vmem:[%s1720_s0] sm:$0xff]  ;;  %v1422_v1 = vld [vmem:[%s1720_s0 + $0x10] sm:$0xff] }
  0x10   :  { %v231_v8 = vunpack.c.0.s8 %v227_v63  ;;  %v239_v13 = vunpack.c.0.s8 %v1422_v1 }
  0x11   :  { %1097 = vmatpush3.bf16.msra.mxu0 %v1147_v16  ;;  %1133 = vmatpush3.bf16.msra.mxu1 %v1147_v16 }
  0x12   :  { %88 = vperm.xlu1 %1141, %v49_v11   ;;  %1098 = vmatprep.subr.bf16.mxu0 %v1148_v19 }
  0x13   :  { %83 = vperm.xlu0 %1140, %v48_v12   ;;  %1126 = vmatprep.subr.bf16.mxu1 %v1148_v19 }
  0x15   :  { %1099 = vmatpush3.bf16.msra.mxu0 %v1148_v19  ;;  %1134 = vmatpush3.bf16.msra.mxu1 %v1148_v19 }
  0x16   :  { %128 = vperm.xlu1 %1141, %v57_v14   ;;  %1100 = vmatprep.subr.bf16.mxu0 %v1149_v22 }
  0x17   :  { %123 = vperm.xlu0 %1140, %v56_v15   ;;  %1127 = vmatprep.subr.bf16.mxu1 %v1149_v22 }
  0x19   :  { %1101 = vmatpush3.bf16.msra.mxu0 %v1149_v22  ;;  %1135 = vmatpush3.bf16.msra.mxu1 %v1149_v22  ;;  %v240_v22 = vunpack.c.1.s8 %v1422_v1 }
  0x1a   :  { %98 = vperm.xlu1 %1141, %v51_v17   ;;  %1102 = vmatprep.subr.bf16.mxu0 %v1150_v25  ;;  %v232_v17 = vunpack.c.1.s8 %v227_v63 }
  0x1b   :  { %93 = vperm.xlu0 %1140, %v50_v18   ;;  %1128 = vmatprep.subr.bf16.mxu1 %v1150_v25 }
  0x1d   :  { %1103 = vmatpush3.bf16.msra.mxu0 %v1150_v25  ;;  %1136 = vmatpush3.bf16.msra.mxu1 %v1150_v25 }
  0x1e   :  { %138 = vperm.xlu1 %1141, %v59_v20   ;;  %1104 = vmatprep.subr.bf16.mxu0 %v1151_v28 }
  0x1f   :  { %133 = vperm.xlu0 %1140, %v58_v21   ;;  %1129 = vmatprep.subr.bf16.mxu1 %v1151_v28  ;;  %v247_v21 = vcvt.s32.f32 %v231_v8 }
  0x21   :  { %1105 = vmatpush3.bf16.msra.mxu0 %v1151_v28  ;;  %1137 = vmatpush3.bf16.msra.mxu1 %v1151_v28  ;;  %v255_v28 = vcvt.s32.f32 %v239_v13 }
  0x22   :  { %554 = vperm.xlu1 %1141, %v532_v23   ;;  %v233_v23 = vunpack.c.2.s8 %v227_v63 }
  0x23   :  { %549 = vperm.xlu0 %1140, %v531_v24  }
  0x26   :  { %564 = vperm.xlu1 %1141, %v534_v26  }
  0x27   :  { %559 = vperm.xlu0 %1140, %v533_v27  }
  0x2a   :  { %574 = vperm.xlu1 %1141, %v536_v29   ;;  %v234_v29 = vunpack.c.3.s8 %v227_v63 }
  0x2b   :  { %569 = vperm.xlu0 %1140, %v535_v30  }
  0x2e   :  { %584 = vperm.xlu1 %1141, %v538_v31  }
  0x2f   :  { %579 = vperm.xlu0 %1140, %v537_v32  }
  0x32   :  { %594 = vperm.xlu1 %1141, %v540_v33   ;;  %v242_v33 = vunpack.c.3.s8 %v1422_v1 }
  0x33   :  { %589 = vperm.xlu0 %1140, %v539_v34  }
  0x36   :  { %604 = vperm.xlu1 %1141, %v542_v35  }
  0x37   :  { %599 = vperm.xlu0 %1140, %v541_v36  }
  0x3a   :  { %614 = vperm.xlu1 %1141, %v544_v37  }
  0x3b   :  { %609 = vperm.xlu0 %1140, %v543_v38   ;;  %v248_v38 = vcvt.s32.f32 %v232_v17 }
  0x3e   :  { %624 = vperm.xlu1 %1141, %v546_v39   ;;  %v256_v39 = vcvt.s32.f32 %v240_v22 }
  0x3f   :  { %619 = vperm.xlu0 %1140, %v545_v40   ;;  %v249_v40 = vcvt.s32.f32 %v233_v23 }
  0x81   :  { %v104_v42 = vpop.permute.xlu1 %103 }
  0x82   :  { %v64_v43 = vpop.permute.xlu0 %63  ;;  %v155_v44 = vadd.f32 %v1408_v41, %v104_v42 }
  0x83   :  { %v147_v45 = vadd.f32 %v1408_v41, %v64_v43 }
  0x84   :  { %v171_v46 = vmul.f32 0.2, %v155_v44 }
  0x85   :  { %v163_v47 = vmul.f32 0.2, %v147_v45  ;;  %v109_v48 = vpop.permute.xlu1 %108 }
  0x86   :  { %v69_v49 = vpop.permute.xlu0 %68  ;;  %v187_v50 = vmax.f32 %v155_v44, %v171_v46  ;;  %v156_v52 = vadd.f32 %v1408_v41, %v109_v48  ;;  %v241_v48 = vunpack.c.2.s8 %v1422_v1 }
  0x87   :  { %v179_v51 = vmax.f32 %v147_v45, %v163_v47  ;;  %v148_v53 = vadd.f32 %v1408_v41, %v69_v49  ;;  %v250_v47 = vcvt.s32.f32 %v234_v29 }
  0x88   :  { %v211_v54 = vmul.f32 1.442695, %v187_v50  ;;  %v172_v56 = vmul.f32 0.2, %v156_v52  ;;  %v257_v22 = vcvt.s32.f32 %v241_v48 }
  0x89   :  { %v195_v55 = vmul.f32 1.442695, %v179_v51  ;;  %v164_v57 = vmul.f32 0.2, %v148_v53  ;;  %v79_v58 = vpop.permute.xlu1 %78 }
  0x8a   :  { %v74_v59 = vpop.permute.xlu0 %73  ;;  %v188_v60 = vmax.f32 %v156_v52, %v172_v56  ;;  %v150_v61 = vadd.f32 %v1408_v41, %v79_v58  ;;  %1152 = vpow2.f32 %v211_v54 }
  0x8b   :  { %v149_v62 = vadd.f32 %v1408_v41, %v74_v59  ;;  %v180_v0 = vmax.f32 %v148_v53, %v164_v57  ;;  %1154 = vpow2.f32 %v195_v55  ;;  %v258_v53 = vcvt.s32.f32 %v242_v33 }
  0x8c   :  { %v213_v2 = vmul.f32 1.442695, %v188_v60  ;;  %v166_v3 = vmul.f32 0.2, %v150_v61 }
  0x8d   :  { %v165_v4 = vmul.f32 0.2, %v149_v62  ;;  %v197_v5 = vmul.f32 1.442695, %v180_v0  ;;  %v119_v6 = vpop.permute.xlu1 %118 }
  0x8e   :  { %v114_v7 = vpop.permute.xlu0 %113  ;;  %1156 = vpow2.f32 %v213_v2  ;;  %v182_v9 = vmax.f32 %v150_v61, %v166_v3  ;;  %v158_v11 = vadd.f32 %v1408_v41, %v119_v6  ;;  %v1437_v61 = vld [vmem:[%s1720_s0 + $0x8] sm:$0xff] }
  0x8f   :  { %v181_v10 = vmax.f32 %v149_v62, %v165_v4  ;;  %1158 = vpow2.f32 %v197_v5  ;;  %v157_v12 = vadd.f32 %v1408_v41, %v114_v7  ;;  %v235_v8 = vunpack.c.0.s8 %v1437_v61 }
  0x90   :  { %v201_v14 = vmul.f32 1.442695, %v182_v9  ;;  %v174_v16 = vmul.f32 0.2, %v158_v11  ;;  %v237_v48 = vunpack.c.2.s8 %v1437_v61 }
  0x91   :  { %v199_v15 = vmul.f32 1.442695, %v181_v10  ;;  %v173_v18 = vmul.f32 0.2, %v157_v12  ;;  %v89_v19 = vpop.permute.xlu1 %88 }
  0x92   :  { %v84_v20 = vpop.permute.xlu0 %83  ;;  %1160 = vpow2.f32 %v201_v14  ;;  %v190_v24 = vmax.f32 %v158_v11, %v174_v16  ;;  %v152_v25 = vadd.f32 %v1408_v41, %v89_v19  ;;  %v230_v16 = vld [vmem:[%s1720_s0 + $0x18] sm:$0xff] }
  0x93   :  { %v151_v26 = vadd.f32 %v1408_v41, %v84_v20  ;;  %1162 = vpow2.f32 %v199_v15  ;;  %v189_v27 = vmax.f32 %v157_v12, %v173_v18  ;;  %v236_v15 = vunpack.c.1.s8 %v1437_v61 }
  0x94   :  { %v217_v30 = vmul.f32 1.442695, %v190_v24  ;;  %v168_v31 = vmul.f32 0.2, %v152_v25  ;;  %v1153_v34 = vpop.eup %1152 }
  0x95   :  { %v167_v32 = vmul.f32 0.2, %v151_v26  ;;  %v215_v35 = vmul.f32 1.442695, %v189_v27  ;;  %v129_v36 = vpop.permute.xlu1 %128  ;;  %v1155_v42 = vpop.eup %1154  ;;  %v271_v59 = vmul.f32 %v1153_v34, %v255_v28  ;;  %v244_v27 = vunpack.c.1.s8 %v230_v16 }
  0x96   :  { %v124_v37 = vpop.permute.xlu0 %123  ;;  %1164 = vpow2.f32 %v217_v30  ;;  %v184_v43 = vmax.f32 %v152_v25, %v168_v31  ;;  %v160_v45 = vadd.f32 %v1408_v41, %v129_v36  ;;  %v263_v58 = vmul.f32 %v1155_v42, %v247_v21 }
  0x97   :  { %v183_v44 = vmax.f32 %v151_v26, %v167_v32  ;;  %1166 = vpow2.f32 %v215_v35  ;;  %v159_v46 = vadd.f32 %v1408_v41, %v124_v37  ;;  %v252_v32 = vcvt.s32.f32 %v236_v15 }
  0x98   :  { %v1157_v49 = vpop.eup %1156  ;;  %v205_v50 = vmul.f32 1.442695, %v184_v43  ;;  %v176_v52 = vmul.f32 0.2, %v160_v45  ;;  %v251_v34 = vcvt.s32.f32 %v235_v8  ;;  %v243_v35 = vunpack.c.0.s8 %v230_v16 }
  0x99   :  { %v203_v51 = vmul.f32 1.442695, %v183_v44  ;;  %v1159_v54 = vpop.eup %1158  ;;  %v175_v55 = vmul.f32 0.2, %v159_v46  ;;  %v99_v56 = vpop.permute.xlu1 %98  ;;  %v272_v60 = vmul.f32 %v1157_v49, %v256_v39  ;;  %v260_v39 = vcvt.s32.f32 %v244_v27 }
  0x9a   :  { %v94_v57 = vpop.permute.xlu0 %93  ;;  %1168 = vpow2.f32 %v205_v50  ;;  %v192_v62 = vmax.f32 %v160_v45, %v176_v52  ;;  %v154_v63 = vadd.f32 %v1408_v41, %v99_v56  ;;  %v264_v2 = vmul.f32 %v1159_v54, %v248_v38 }
  0x9b   :  { %v153_v0 = vadd.f32 %v1408_v41, %v94_v57  ;;  %1170 = vpow2.f32 %v203_v51  ;;  %v191_v1 = vmax.f32 %v159_v46, %v175_v55  ;;  %v283_v3 = vpack.c.bf16 %v272_v60, %v271_v59 }
  0x9c   :  { %v1161_v4 = vpop.eup %1160  ;;  %v221_v5 = vmul.f32 1.442695, %v192_v62  ;;  %v170_v6 = vmul.f32 0.2, %v154_v63  ;;  %v279_v13 = vpack.c.bf16 %v264_v2, %v263_v58  ;;  %v238_v45 = vunpack.c.3.s8 %v1437_v61 }
  0x9d   :  { %v169_v7 = vmul.f32 0.2, %v153_v0  ;;  %v1163_v9 = vpop.eup %1162  ;;  %v219_v10 = vmul.f32 1.442695, %v191_v1  ;;  %v139_v11 = vpop.permute.xlu1 %138  ;;  %1114 = vmatprep.mubr.bf16.mxu1 %v283_v3  ;;  %v266_v14 = vmul.f32 %v1161_v4, %v250_v47  ;;  %v259_v47 = vcvt.s32.f32 %v243_v35 }
  0x9e   :  { %v134_v12 = vpop.permute.xlu0 %133  ;;  %1172 = vpow2.f32 %v221_v5  ;;  %v186_v17 = vmax.f32 %v154_v63, %v170_v6  ;;  %v162_v19 = vadd.f32 %v1408_v41, %v139_v11  ;;  %1106 = vmatprep.mubr.bf16.mxu0 %v279_v13  ;;  %v265_v21 = vmul.f32 %v1163_v9, %v249_v40 }
  0x9f   :  { %v185_v18 = vmax.f32 %v153_v0, %v169_v7  ;;  %1174 = vpow2.f32 %v219_v10  ;;  %v161_v20 = vadd.f32 %v1408_v41, %v134_v12  ;;  %v246_v54 = vunpack.c.3.s8 %v230_v16 }
  0xa0   :  { %v1165_v23 = vpop.eup %1164  ;;  %v209_v24 = vmul.f32 1.442695, %v186_v17  ;;  %v178_v26 = vmul.f32 0.2, %v162_v19  ;;  %v280_v30 = vpack.c.bf16 %v266_v14, %v265_v21  ;;  %v253_v56 = vcvt.s32.f32 %v237_v48  ;;  %v501_v17 = vld [vmem:[%s1721_s1 + $0x10] sm:$0xff] }
  0xa1   :  { %v207_v25 = vmul.f32 1.442695, %v185_v18  ;;  %v1167_v28 = vpop.eup %1166  ;;  %v177_v29 = vmul.f32 0.2, %v161_v20  ;;  %v274_v31 = vmul.f32 %v1165_v23, %v258_v53  ;;  %v254_v53 = vcvt.s32.f32 %v238_v45  ;;  %v555_v9 = vpop.permute.xlu1 %554  ;;  %v499_v18 = vld [vmem:[%s1721_s1] sm:$0xff] }
  0xa2   :  { %1176 = vpow2.f32 %v209_v24  ;;  %v194_v33 = vmax.f32 %v162_v19, %v178_v26  ;;  %1107 = vmatmul.mubr.bf16.vlgmr.msra.gmra.mrb[0].mxu0 %v280_v30  ;;  %v273_v41 = vmul.f32 %v1167_v28, %v257_v22  ;;  %v245_v57 = vunpack.c.2.s8 %v230_v16  ;;  %v550_v8 = vpop.permute.xlu0 %549  ;;  %v509_v24 = vld [vmem:[%s1721_s1 + $0x50] sm:$0xff] }
  0xa3   :  { %1178 = vpow2.f32 %v207_v25  ;;  %v193_v36 = vmax.f32 %v161_v20, %v177_v29  ;;  %v262_v63 = vcvt.s32.f32 %v246_v54  ;;  %v1249_v7 = vmov 32   ;;  %v502_v20 = vld [vmem:[%s1721_s1 + $0x18] sm:$0xff]  ;;  %v507_v29 = vld [vmem:[%s1721_s1 + $0x40] sm:$0xff] }
  0xa4   :  { %v1169_v37 = vpop.eup %1168  ;;  %v225_v38 = vmul.f32 1.442695, %v194_v33  ;;  %v284_v43 = vpack.c.bf16 %v274_v31, %v273_v41  ;;  %v261_v61 = vcvt.s32.f32 %v245_v57  ;;  %1142 = vset.pattern.permute.xlu1 %v1249_v7  ;;  %1143 = vset.pattern.permute.xlu0 %v1249_v7  ;;  %v627_v22 = vmul.f32 %v550_v8, %v499_v18  ;;  %v510_v33 = vld [vmem:[%s1721_s1 + $0x58] sm:$0xff] }
  0xa5   :  { %v1171_v40 = vpop.eup %1170  ;;  %v223_v42 = vmul.f32 1.442695, %v193_v36  ;;  %v268_v44 = vmul.f32 %v1169_v37, %v252_v32  ;;  %v565_v11 = vpop.permute.xlu1 %564  ;;  %v506_v54 = vld [vmem:[%s1721_s1 + $0x38] sm:$0xff] }
  0xa6   :  { %1180 = vpow2.f32 %v225_v38  ;;  %v267_v46 = vmul.f32 %v1171_v40, %v251_v34  ;;  %1115 = vmatmul.mubr.bf16.vlgmr.msra.gmra.mrb[0].mxu1 %v284_v43  ;;  %v560_v10 = vpop.permute.xlu0 %559  ;;  %v630_v28 = vmul.f32 %v565_v11, %v502_v20  ;;  %v500_v40 = vld [vmem:[%s1721_s1 + $0x8] sm:$0xff]  ;;  %v513_v20 = vld [vmem:[%s1721_s1 + $0x70] sm:$0xff] }
  0xa7   :  { %1182 = vpow2.f32 %v223_v42  ;;  %v629_v21 = vmul.f32 %v560_v10, %v501_v17  ;;  %v628_v48 = vmul.f32 %v555_v9, %v500_v40  ;;  %v512_v9 = vld [vmem:[%s1721_s1 + $0x68] sm:$0xff] }
  0xa8   :  { %v1173_v49 = vpop.eup %1172  ;;  %v281_v50 = vpack.c.bf16 %v268_v44, %v267_v46  ;;  %v508_v44 = vld [vmem:[%s1721_s1 + $0x48] sm:$0xff] }
  0xa9   :  { %v1175_v51 = vpop.eup %1174  ;;  %v276_v52 = vmul.f32 %v1173_v49, %v260_v39  ;;  %v1452_v13 = vpop.permute.xlu1 %574 }
  0xaa   :  { %1110 = vmatprep.mubr.bf16.mxu0 %v281_v50  ;;  %v275_v55 = vmul.f32 %v1175_v51, %v259_v47  ;;  %v1450_v12 = vpop.permute.xlu0 %569  ;;  %v505_v50 = vld [vmem:[%s1721_s1 + $0x30] sm:$0xff] }
  0xac   :  { %v1177_v58 = vpop.eup %1176  ;;  %v285_v59 = vpack.c.bf16 %v276_v52, %v275_v55 }
  0xad   :  { %v1179_v60 = vpop.eup %1178  ;;  %v270_v62 = vmul.f32 %v1177_v58, %v254_v53  ;;  %v585_v15 = vpop.permute.xlu1 %584  ;;  %v504_v58 = vld [vmem:[%s1721_s1 + $0x28] sm:$0xff] }
  0xae   :  { %1118 = vmatprep.mubr.bf16.mxu1 %v285_v59  ;;  %v269_v0 = vmul.f32 %v1179_v60, %v253_v56  ;;  %v580_v14 = vpop.permute.xlu0 %579  ;;  %v503_v56 = vld [vmem:[%s1721_s1 + $0x20] sm:$0xff]  ;;  %v634_v60 = vmul.f32 %v585_v15, %v506_v54 }
  0xaf   :  { %v633_v57 = vmul.f32 %v580_v14, %v505_v50 }
  0xb0   :  { %v1181_v1 = vpop.eup %1180  ;;  %v282_v2 = vpack.c.bf16 %v270_v62, %v269_v0 }
  0xb1   :  { %v1183_v3 = vpop.eup %1182  ;;  %v278_v4 = vmul.f32 %v1181_v1, %v262_v63  ;;  %v595_v19 = vpop.permute.xlu1 %594  ;;  %v631_v1 = vmul.f32 %v1450_v12, %v503_v56 }
  0xb2   :  { %1111 = vmatmul.mubr.bf16.gmra.mrb[4].mxu0 %v282_v2  ;;  %v277_v5 = vmul.f32 %v1183_v3, %v261_v61  ;;  %v590_v16 = vpop.permute.xlu0 %589  ;;  %v636_v49 = vmul.f32 %v595_v19, %v508_v44 }
  0xb3   :  { %v635_v37 = vmul.f32 %v590_v16, %v507_v29 }
  0xb4   :  { %v286_v6 = vpack.c.bf16 %v278_v4, %v277_v5  ;;  %v632_v5 = vmul.f32 %v1452_v13, %v504_v58 }
  0xb5   :  { %v605_v32 = vpop.permute.xlu1 %604 }
  0xb6   :  { %1119 = vmatmul.mubr.bf16.gmra.mrb[4].mxu1 %v286_v6  ;;  %v600_v23 = vpop.permute.xlu0 %599  ;;  %v638_v42 = vmul.f32 %v605_v32, %v510_v33  ;;  %v511_v6 = vld [vmem:[%s1721_s1 + $0x60] sm:$0xff] }
  0xb7   :  { %v637_v34 = vmul.f32 %v600_v23, %v509_v24  ;;  %v514_v23 = vld [vmem:[%s1721_s1 + $0x78] sm:$0xff] }
  0xb9   :  { %v615_v2 = vpop.permute.xlu1 %614 }
  0xba   :  { %v610_v62 = vpop.permute.xlu0 %609  ;;  %v640_v18 = vmul.f32 %v615_v2, %v512_v9 }
  0xbb   :  { %v639_v15 = vmul.f32 %v610_v62, %v511_v6 }
  0xbe   :  { %v620_v19 = vpop.permute.xlu0 %619 }
 0x175   :  { %v1108_v25 = vpop.f32.mrb[0].mxu0 }
 0x176   :  { %v1466_v26 = vadd.f32 %v1108_v25, %v629_v21  ;;  %v401_v27 = vpop.f32.mrb[1].mxu0 }
 0x177   :  { %v1471_v30 = vadd.f32 %v627_v22, %v401_v27  ;;  %v1109_v31 = vpop.f32.mrb[2].mxu0  ;;  %v625_v22 = vpop.permute.xlu1 %624 }
 0x178   :  { %1184 = vrcp.f32 %v1466_v26  ;;  %v404_v35 = vpop.f32.mrb[3].mxu0  ;;  %v1478_v36 = vadd.f32 %v1109_v31, %v630_v28  ;;  %v641_v28 = vmul.f32 %v620_v19, %v513_v20  ;;  %v642_v31 = vmul.f32 %v625_v22, %v514_v23 }
 0x179   :  { %1186 = vrcp.f32 %v1471_v30  ;;  %v1116_v41 = vpop.f32.mrb[0].mxu1  ;;  %v1497_v51 = vadd.f32 %v628_v48, %v404_v35 }
 0x17a   :  { %v1480_v38 = vadd.f32 %v1116_v41, %v637_v34  ;;  %v433_v39 = vpop.f32.mrb[1].mxu1 }
 0x17b   :  { %v1117_v43 = vpop.f32.mrb[2].mxu1  ;;  %v1489_v45 = vadd.f32 %v635_v37, %v433_v39 }
 0x17c   :  { %1188 = vrcp.f32 %v1480_v38  ;;  %v436_v46 = vpop.f32.mrb[3].mxu1  ;;  %v1492_v47 = vadd.f32 %v1117_v43, %v638_v42 }
 0x17d   :  { %1190 = vrcp.f32 %v1478_v36  ;;  %v1501_v52 = vadd.f32 %v636_v49, %v436_v46 }
 0x17e   :  { %1192 = vrcp.f32 %v1489_v45 }
 0x17f   :  { %1194 = vrcp.f32 %v1492_v47 }
 0x180   :  { %1196 = vrcp.f32 %v1497_v51 }
 0x181   :  { %1198 = vrcp.f32 %v1501_v52 }
 0x182   :  { %v1185_v53 = vpop.eup %1184 }
 0x183   :  { %v1187_v55 = vpop.eup %1186  ;;  %687 = vperm.xlu1 %1142, %v1185_v53  }
 0x184   :  { %677 = vperm.xlu0 %1143, %v1187_v55  }
 0x185   :  { %v1112_v59 = vpop.f32.mrb[4].mxu0 }
 0x186   :  { %v1514_v63 = vadd.f32 %v1112_v59, %v633_v57  ;;  %v417_v0 = vpop.f32.mrb[5].mxu0  ;;  %v1189_v61 = vpop.eup %1188 }
 0x187   :  { %v1113_v3 = vpop.f32.mrb[6].mxu0  ;;  %v1191_v4 = vpop.eup %1190  ;;  %727 = vperm.xlu1 %1142, %v1189_v61   ;;  %v1527_v10 = vadd.f32 %v631_v1, %v417_v0  ;;  %v867_v1 = vlaneseq }
 0x188   :  { %1200 = vrcp.f32 %v1514_v63  ;;  %v1522_v7 = vadd.f32 %v1113_v3, %v634_v60  ;;  %v420_v8 = vpop.f32.mrb[7].mxu0  ;;  %692 = vperm.xlu0 %1143, %v1191_v4   ;;  %v1193_v14 = vpop.eup %1192 }
 0x189   :  { %v1120_v11 = vpop.f32.mrb[4].mxu1  ;;  %v1530_v12 = vadd.f32 %v632_v5, %v420_v8  ;;  %v1195_v17 = vpop.eup %1194  ;;  %v1576_v8 = vand.u32 127, %v867_v1 }
 0x18a   :  { %1202 = vrcp.f32 %v1522_v7  ;;  %v449_v13 = vpop.f32.mrb[5].mxu1  ;;  %v1197_v27 = vpop.eup %1196  ;;  %v1544_v32 = vadd.f32 %v1120_v11, %v641_v28 }
 0x18b   :  { %v1121_v16 = vpop.f32.mrb[6].mxu1  ;;  %717 = vperm.xlu1 %1142, %v1193_v14   ;;  %1204 = vrcp.f32 %v1527_v10  ;;  %v1539_v24 = vadd.f32 %v639_v15, %v449_v13  ;;  %v1199_v29 = vpop.eup %1198  ;;  %vm869_vm0 = vcmp.eq.s32.totalorder %v1576_v8, 32 }
 0x18c   :  { %v452_v21 = vpop.f32.mrb[7].mxu1  ;;  %732 = vperm.xlu0 %1143, %v1195_v17   ;;  %1206 = vrcp.f32 %v1530_v12  ;;  %v1547_v34 = vadd.f32 %v1121_v16, %v642_v31 }
 0x18d   :  { %v1542_v25 = vadd.f32 %v640_v18, %v452_v21  ;;  %1208 = vrcp.f32 %v1539_v24 }
 0x18f   :  { %682 = vperm.xlu1 %1142, %v1197_v27   ;;  %1210 = vrcp.f32 %v1542_v25 }
 0x190   :  { %722 = vperm.xlu0 %1143, %v1199_v29   ;;  %1212 = vrcp.f32 %v1544_v32 }
 0x191   :  { %1214 = vrcp.f32 %v1547_v34 }
 0x192   :  { %v1201_v33 = vpop.eup %1200 }
 0x193   :  { %707 = vperm.xlu1 %1142, %v1201_v33  }
 0x194   :  { %v1203_v35 = vpop.eup %1202 }
 0x195   :  { %712 = vperm.xlu0 %1143, %v1203_v35   ;;  %v1205_v41 = vpop.eup %1204 }
 0x196   :  { %v1207_v37 = vpop.eup %1206 }
 0x197   :  { %697 = vperm.xlu1 %1142, %v1205_v41   ;;  %v1209_v39 = vpop.eup %1208 }
 0x199   :  { %702 = vperm.xlu0 %1143, %v1207_v37   ;;  %v1211_v40 = vpop.eup %1210 }
 0x19a   :  { %v1213_v42 = vpop.eup %1212 }
 0x19b   :  { %737 = vperm.xlu1 %1142, %v1209_v39   ;;  %v1215_v43 = vpop.eup %1214 }
 0x19d   :  { %742 = vperm.xlu0 %1143, %v1211_v40  }
 0x19f   :  { %747 = vperm.xlu1 %1142, %v1213_v42  }
 0x1a1   :  { %752 = vperm.xlu0 %1143, %v1215_v43  }
 0x202   :  { %v688_v44 = vpop.permute.xlu1 %687 }
 0x203   :  { %v757_v46 = vmul.f32 %v688_v44, %v1466_v26  ;;  %v678_v48 = vpop.permute.xlu0 %677 }
 0x204   :  { %v1554_v49 = vmul.f32 %v678_v48, %v1471_v30 }
 0x205   :  { %v789_v50 = vmin.f32 %v757_v46, 0.0  ;;  %vm773_vm1 = vcmp.gt.f32.partialorder %v757_v46, 0.0 }
 0x206   :  { %v787_v53 = vmin.f32 %v1554_v49, 0.0  ;;  %v728_v54 = vpop.permute.xlu1 %727  ;;  %vm771_vm2 = vcmp.gt.f32.partialorder %v1554_v49, 0.0 }
 0x207   :  { %v807_v55 = vmul.f32 1.442695, %v789_v50  ;;  %v1558_v56 = vmul.f32 %v728_v54, %v1480_v38  ;;  %v693_v57 = vpop.permute.xlu0 %692 }
 0x208   :  { %v803_v58 = vmul.f32 1.442695, %v787_v53  ;;  %v1561_v59 = vmul.f32 %v693_v57, %v1478_v36 }
 0x209   :  { %1216 = vpow2.f32 %v807_v55  ;;  %v797_v26 = vmin.f32 %v1558_v56, 0.0  ;;  %vm781_vm3 = vcmp.gt.f32.partialorder %v1558_v56, 0.0 }
 0x20a   :  { %v790_v60 = vmin.f32 %v1561_v59, 0.0  ;;  %v718_v30 = vpop.permute.xlu1 %717  ;;  %1218 = vpow2.f32 %v803_v58  ;;  %vm774_vm4 = vcmp.gt.f32.partialorder %v1561_v59, 0.0 }
 0x20b   :  { %v823_v62 = vmul.f32 1.442695, %v797_v26  ;;  %v1566_v0 = vmul.f32 %v718_v30, %v1489_v45  ;;  %v733_v61 = vpop.permute.xlu0 %732 }
 0x20c   :  { %v809_v38 = vmul.f32 1.442695, %v790_v60  ;;  %v1569_v2 = vmul.f32 %v733_v61, %v1492_v47 }
 0x20d   :  { %1220 = vpow2.f32 %v823_v62  ;;  %v795_v36 = vmin.f32 %v1566_v0, 0.0  ;;  %vm779_vm5 = vcmp.gt.f32.partialorder %v1566_v0, 0.0 }
 0x20e   :  { %1222 = vpow2.f32 %v809_v38  ;;  %v798_v3 = vmin.f32 %v1569_v2, 0.0  ;;  %v683_v4 = vpop.permute.xlu1 %682  ;;  %vm782_vm6 = vcmp.gt.f32.partialorder %v1569_v2, 0.0 }
 0x20f   :  { %v819_v5 = vmul.f32 1.442695, %v795_v36  ;;  %v1574_v6 = vmul.f32 %v683_v4, %v1497_v51  ;;  %v723_v45 = vpop.permute.xlu0 %722 }
 0x210   :  { %v825_v9 = vmul.f32 1.442695, %v798_v3  ;;  %v1579_v11 = vmul.f32 %v723_v45, %v1501_v52 }
 0x211   :  { %1224 = vpow2.f32 %v819_v5  ;;  %v788_v47 = vmin.f32 %v1574_v6, 0.0  ;;  %vm772_vm7 = vcmp.gt.f32.partialorder %v1574_v6, 0.0 }
 0x212   :  { %1226 = vpow2.f32 %v825_v9  ;;  %v796_v13 = vmin.f32 %v1579_v11, 0.0  ;;  %v708_v14 = vpop.permute.xlu1 %707  ;;  %vm780_vm8 = vcmp.gt.f32.partialorder %v1579_v11, 0.0 }
 0x213   :  { %v1217_v15 = vpop.eup %1216  ;;  %v805_v16 = vmul.f32 1.442695, %v788_v47  ;;  %v1584_v17 = vmul.f32 %v708_v14, %v1514_v63 }
 0x214   :  { %v713_v51 = vpop.permute.xlu0 %712  ;;  %v981_v18 = vadd.f32 -1.0, %v1217_v15  ;;  %v821_v19 = vmul.f32 1.442695, %v796_v13  ;;  %v1219_v21 = vpop.eup %1218 }
 0x215   :  { %v1588_v52 = vmul.f32 %v713_v51, %v1522_v7  ;;  %1228 = vpow2.f32 %v805_v16  ;;  %v793_v20 = vmin.f32 %v1584_v17, 0.0  ;;  %vm777_vm9 = vcmp.gt.f32.partialorder %v1584_v17, 0.0 }
 0x216   :  { %1230 = vpow2.f32 %v821_v19  ;;  %v698_v22 = vpop.permute.xlu1 %697  ;;  %v853_v27 = vsel %vm773_vm1, %v757_v46, %v981_v18 }
 0x217   :  { %v794_v63 = vmin.f32 %v1588_v52, 0.0  ;;  %v1221_v23 = vpop.eup %1220  ;;  %v815_v7 = vmul.f32 1.442695, %v793_v20  ;;  %v1597_v28 = vmul.f32 %v698_v22, %v1527_v10  ;;  %v872_v40 = vsel %vm869_vm0, 1.0, %v853_v27 }
 0x218   :  { %v703_v29 = vpop.permute.xlu0 %702  ;;  %v1223_v31 = vpop.eup %1222  ;;  %v989_v33 = vadd.f32 -1.0, %v1221_v23  ;;  %v979_v10 = vadd.f32 -1.0, %v1219_v21  ;;  %vm778_vm10 = vcmp.gt.f32.partialorder %v1588_v52, 0.0 }
 0x219   :  { %v817_v35 = vmul.f32 1.442695, %v794_v63  ;;  %v1601_v41 = vmul.f32 %v703_v29, %v1530_v12  ;;  %v982_v37 = vadd.f32 -1.0, %v1223_v31  ;;  %1232 = vpow2.f32 %v815_v7 }
 0x21a   :  { %v791_v39 = vmin.f32 %v1597_v28, 0.0  ;;  %v738_v43 = vpop.permute.xlu1 %737  ;;  %v861_v12 = vsel %vm781_vm3, %v1558_v56, %v989_v33  ;;  %vm775_vm11 = vcmp.gt.f32.partialorder %v1597_v28, 0.0 }
 0x21b   :  { %1234 = vpow2.f32 %v817_v35  ;;  %v792_v42 = vmin.f32 %v1601_v41, 0.0  ;;  %v1225_v44 = vpop.eup %1224  ;;  %v854_v46 = vsel %vm774_vm4, %v1561_v59, %v982_v37  ;;  %v1615_v50 = vmul.f32 %v738_v43, %v1539_v24 }
 0x21c   :  { %v811_v48 = vmul.f32 1.442695, %v791_v39  ;;  %v743_v53 = vpop.permute.xlu0 %742  ;;  %v1227_v54 = vpop.eup %1226  ;;  %v873_v55 = vsel %vm869_vm0, 1.0, %v854_v46  ;;  %v987_v57 = vadd.f32 -1.0, %v1225_v44  ;;  %v851_v24 = vsel %vm771_vm2, %v1554_v49, %v979_v10 }
 0x21d   :  { %v813_v58 = vmul.f32 1.442695, %v792_v42  ;;  %v1620_v26 = vmul.f32 %v743_v53, %v1542_v25  ;;  %v1035_v60 = vpack.c.bf16 %v873_v55, %v872_v40  ;;  %v990_v56 = vadd.f32 -1.0, %v1227_v54 }
 0x21e   :  { %1236 = vpow2.f32 %v811_v48  ;;  %v880_v59 = vsel %vm869_vm0, 1.0, %v861_v12  ;;  %v799_v30 = vmin.f32 %v1615_v50, 0.0  ;;  %v748_v62 = vpop.permute.xlu1 %747  ;;  %v859_v25 = vsel %vm779_vm5, %v1566_v0, %v987_v57 }
 0x21f   :  { %1238 = vpow2.f32 %v813_v58  ;;  %v1229_v61 = vpop.eup %1228  ;;  %1067 = vst [vmem:[%s1722_s6 + $0x8] sm:$0xff] %v1035_v60   ;;  %v862_v49 = vsel %vm782_vm6, %v1569_v2, %v990_v56  ;;  %v800_v1 = vmin.f32 %v1620_v26, 0.0  ;;  %v1640_v38 = vmul.f32 %v748_v62, %v1544_v32 }
 0x220   :  { %v753_v36 = vpop.permute.xlu0 %752  ;;  %v1231_v3 = vpop.eup %1230  ;;  %v881_v4 = vsel %vm869_vm0, 1.0, %v862_v49  ;;  %v980_v5 = vadd.f32 -1.0, %v1229_v61  ;;  %v827_v45 = vmul.f32 1.442695, %v799_v30  ;;  %v870_v0 = vsel %vm869_vm0, 1.0, %v851_v24 }
 0x221   :  { %v1645_v9 = vmul.f32 %v753_v36, %v1547_v34  ;;  %v1055_v47 = vpack.c.bf16 %v881_v4, %v880_v59  ;;  %v988_v2 = vadd.f32 -1.0, %v1231_v3  ;;  %v829_v13 = vmul.f32 1.442695, %v800_v1 }
 0x222   :  { %v878_v32 = vsel %vm869_vm0, 1.0, %v859_v25  ;;  %v852_v14 = vsel %vm772_vm7, %v1574_v6, %v980_v5  ;;  %1240 = vpow2.f32 %v827_v45  ;;  %v801_v15 = vmin.f32 %v1640_v38, 0.0 }
 0x223   :  { %v1233_v16 = vpop.eup %1232  ;;  %1071 = vst [vmem:[%s1722_s6 + $0x28] sm:$0xff] %v1055_v47   ;;  %v871_v34 = vsel %vm869_vm0, 1.0, %v852_v14  ;;  %v860_v51 = vsel %vm780_vm8, %v1579_v11, %v988_v2  ;;  %1242 = vpow2.f32 %v829_v13  ;;  %v802_v18 = vmin.f32 %v1645_v9, 0.0 }
 0x224   :  { %v1030_v6 = vpack.c.bf16 %v871_v34, %v870_v0  ;;  %v879_v20 = vsel %vm869_vm0, 1.0, %v860_v51  ;;  %v985_v21 = vadd.f32 -1.0, %v1233_v16  ;;  %v831_v63 = vmul.f32 1.442695, %v801_v15 }
 0x225   :  { %v1235_v19 = vpop.eup %1234  ;;  %v1050_v22 = vpack.c.bf16 %v879_v20, %v878_v32  ;;  %v833_v27 = vmul.f32 1.442695, %v802_v18  ;;  %vm776_vm12 = vcmp.gt.f32.partialorder %v1601_v41, 0.0  ;;  %vm783_vm13 = vcmp.gt.f32.partialorder %v1615_v50, 0.0 }
 0x226   :  { %v986_v23 = vadd.f32 -1.0, %v1235_v19  ;;  %1031 = vst [vmem:[%s1722_s6] sm:$0xff] %v1030_v6   ;;  %v857_v11 = vsel %vm777_vm9, %v1584_v17, %v985_v21  ;;  %1244 = vpow2.f32 %v831_v63  ;;  %vm784_vm14 = vcmp.gt.f32.partialorder %v1620_v26, 0.0 }
 0x227   :  { %1070 = vst [vmem:[%s1722_s6 + $0x20] sm:$0xff] %v1050_v22   ;;  %1246 = vpow2.f32 %v833_v27  ;;  %v876_v33 = vsel %vm869_vm0, 1.0, %v857_v11  ;;  %vm785_vm15 = vcmp.gt.f32.partialorder %v1640_v38, 0.0  ;;  %vm786_vm1 = vcmp.gt.f32.partialorder %v1645_v9, 0.0 }
 0x228   :  { %v1237_v7 = vpop.eup %1236  ;;  %v858_v29 = vsel %vm778_vm10, %v1588_v52, %v986_v23 }
 0x229   :  { %v1239_v31 = vpop.eup %1238  ;;  %v877_v35 = vsel %vm869_vm0, 1.0, %v858_v29  ;;  %v983_v37 = vadd.f32 -1.0, %v1237_v7 }
 0x22a   :  { %v1045_v17 = vpack.c.bf16 %v877_v35, %v876_v33  ;;  %v984_v39 = vadd.f32 -1.0, %v1239_v31 }
 0x22b   :  { %v855_v40 = vsel %vm775_vm11, %v1597_v28, %v983_v37 }
 0x22c   :  { %1069 = vst [vmem:[%s1722_s6 + $0x18] sm:$0xff] %v1045_v17   ;;  %v856_v52 = vsel %vm776_vm12, %v1601_v41, %v984_v39  ;;  %v1241_v10 = vpop.eup %1240  ;;  %v874_v42 = vsel %vm869_vm0, 1.0, %v855_v40 }
 0x22d   :  { %v875_v43 = vsel %vm869_vm0, 1.0, %v856_v52  ;;  %v1243_v44 = vpop.eup %1242  ;;  %v991_v46 = vadd.f32 -1.0, %v1241_v10 }
 0x22e   :  { %v1040_v12 = vpack.c.bf16 %v875_v43, %v874_v42  ;;  %v992_v28 = vadd.f32 -1.0, %v1243_v44 }
 0x22f   :  { %v863_v48 = vsel %vm783_vm13, %v1615_v50, %v991_v46 }
 0x230   :  { %1068 = vst [vmem:[%s1722_s6 + $0x10] sm:$0xff] %v1040_v12   ;;  %v1245_v41 = vpop.eup %1244  ;;  %v864_v53 = vsel %vm784_vm14, %v1620_v26, %v992_v28  ;;  %v882_v55 = vsel %vm869_vm0, 1.0, %v863_v48 }
 0x231   :  { %v1247_v54 = vpop.eup %1246  ;;  %v883_v57 = vsel %vm869_vm0, 1.0, %v864_v53  ;;  %v993_v58 = vadd.f32 -1.0, %v1245_v41 }
 0x232   :  { %v1060_v60 = vpack.c.bf16 %v883_v57, %v882_v55  ;;  %v994_v56 = vadd.f32 -1.0, %v1247_v54 }
 0x233   :  { %v865_v24 = vsel %vm785_vm15, %v1640_v38, %v993_v58 }
 0x234   :  { %1072 = vst [vmem:[%s1722_s6 + $0x30] sm:$0xff] %v1060_v60   ;;  %v866_v50 = vsel %vm786_vm1, %v1645_v9, %v994_v56  ;;  %v884_v26 = vsel %vm869_vm0, 1.0, %v865_v24 }
 0x235   :  { %v885_v59 = vsel %vm869_vm0, 1.0, %v866_v50 }
 0x236   :  { %v1065_v30 = vpack.c.bf16 %v885_v59, %v884_v26 }
 0x238   :  { %1073 = vst [vmem:[%s1722_s6 + $0x38] sm:$0xff] %v1065_v30  }

</bundles_post_ra>
